<compile_context>
chip_gen: v6e
topology: v6e:2x2x1
jax: 0.10.0
libtpu: 0.0.40
codegen_flags: <defaults>
</compile_context>

<pallas_src>
import functools

import numpy as np
import jax
import jax.numpy as jnp
from jax.experimental import pallas as pl
from jax.experimental.pallas import tpu as pltpu


# ----------------------------------------------------------------------------
# db3 wavelet filters (pywt convention) and DWT <-> matmul matrices
# ----------------------------------------------------------------------------
_DB3_DEC_LO = np.array([0.035226291882100656, -0.08544127388224149,
                        -0.13501102001039084, 0.4598775021193313,
                        0.8068915093133388, 0.3326705529509569], dtype=np.float64)
_DB3_DEC_HI = np.array([-0.3326705529509569, 0.8068915093133388,
                        -0.4598775021193313, -0.13501102001039084,
                        0.08544127388224149, 0.035226291882100656], dtype=np.float64)
_DB3_REC_LO = _DB3_DEC_LO[::-1].copy()
_DB3_REC_HI = _DB3_DEC_HI[::-1].copy()


def _analysis_matrix(n, dec):
    """pytorch_wavelets afb1d(mode='zero'): strided cross-correlation with the
    reversed decomposition filter on a zero-padded signal."""
    L = len(dec)
    outsize = (n + L - 1) // 2
    p = 2 * (outsize - 1) - n + L
    pad_left = p // 2
    h_rev = dec[::-1]
    A = np.zeros((outsize, n), dtype=np.float64)
    for j in range(outsize):
        for t in range(L):
            i = 2 * j + t - pad_left
            if 0 <= i < n:
                A[j, i] += h_rev[t]
    return A.astype(np.float32)


def _synthesis_matrix(n, rec):
    """pytorch_wavelets sfb1d(mode='zero'): conv_transpose, stride 2,
    padding L-2, with the (un-reversed) reconstruction filter."""
    L = len(rec)
    n_out = 2 * n + 2 - L
    pad = L - 2
    S = np.zeros((n_out, n), dtype=np.float64)
    for i in range(n_out):
        for j in range(n):
            t = i + pad - 2 * j
            if 0 <= t < L:
                S[i, j] += rec[t]
    return S.astype(np.float32)


def _ssl_matrices(H, W):
    """Dense, channel-shared matrices (no block-diagonal C x blow-up).

    The analysis matrices insert the 1-pixel zero border needed by the 3x3
    depthwise convs (zero rows in AH, zero columns in AWT)."""
    A_lo_h = _analysis_matrix(H, _DB3_DEC_LO)
    A_hi_h = _analysis_matrix(H, _DB3_DEC_HI)
    A_lo_w = _analysis_matrix(W, _DB3_DEC_LO)
    A_hi_w = _analysis_matrix(W, _DB3_DEC_HI)
    oh, ow = A_lo_h.shape[0], A_lo_w.shape[0]
    S_lo_h = _synthesis_matrix(oh, _DB3_REC_LO)
    S_hi_h = _synthesis_matrix(oh, _DB3_REC_HI)
    S_lo_w = _synthesis_matrix(ow, _DB3_REC_LO)
    S_hi_w = _synthesis_matrix(ow, _DB3_REC_HI)
    Hout, Wout = S_lo_h.shape[0], S_lo_w.shape[0]
    ohp, owp = oh + 2, ow + 2

    # Height analysis (left multiply): rows [1:1+oh] = lo band, [ohp+1:..] = hi.
    AH = np.zeros((2 * ohp, H), np.float32)
    AH[1:1 + oh, :] = A_lo_h
    AH[ohp + 1:ohp + 1 + oh, :] = A_hi_h

    # Width analysis (right multiply), dense and shared by every channel.
    AWT = np.zeros((W, 2 * owp), np.float32)
    AWT[:, 1:1 + ow] = A_lo_w.T
    AWT[:, owp + 1:owp + 1 + ow] = A_hi_w.T

    SH = np.stack([S_lo_h, S_hi_h]).astype(np.float32)        # (2, Hout, oh)
    SWT = np.stack([S_lo_w.T, S_hi_w.T]).astype(np.float32)   # (2, ow, Wout)
    return AH, AWT, SH, SWT, oh, ow, Hout, Wout


# ----------------------------------------------------------------------------
# Kernel 1: fused qkv = 1x1 conv + depthwise 3x3 conv, grid (B, 2) = (b, k/v)
# ----------------------------------------------------------------------------
def _qkv_kernel(x_ref, w1_ref, wdw_ref, mask_ref, o_ref, pad_ref, *, W, P0):
    # x: (1, C, N) bf16   w1: (1, C, C) bf16   wdw: (1, 9, C, 1) f32
    # mask: (2, N) f32    o: (1, 1, C, N) bf16  pad: (C, N + 2*P0) bf16 scratch
    C = o_ref.shape[2]
    N = o_ref.shape[3]
    # 1x1 conv (channel mix) for this channel-group: bf16 MXU, f32 accumulate.
    t = jnp.dot(w1_ref[0], x_ref[0], preferred_element_type=jnp.float32)  # (C, N)
    # Zero only the wings every step (megacore-safe); the interior is fully
    # overwritten.  P0 is 128-aligned so the big store is lane-aligned.
    pad_ref[:, :P0] = jnp.zeros((C, P0), pad_ref.dtype)
    pad_ref[:, P0 + N:] = jnp.zeros((C, P0), pad_ref.dtype)
    pad_ref[:, P0:P0 + N] = t.astype(pad_ref.dtype)

    m_left = mask_ref[0:1, :]    # (1, N): 0 where the left neighbour wraps a row
    m_right = mask_ref[1:2, :]   # (1, N): 0 where the right neighbour wraps

    def col_taps(dx):            # 3 vertical taps for one horizontal offset
        acc = None
        for dy in range(3):
            s = P0 + (dy - 1) * W + (dx - 1)
            v = wdw_ref[0, dy * 3 + dx] * pad_ref[:, s:s + N]
            acc = v if acc is None else acc + v
        return acc

    # One mask multiply per horizontal group (2 total) instead of per tap (6).
    acc = col_taps(1) + m_left * col_taps(0) + m_right * col_taps(2)
    o_ref[0, 0] = acc.astype(o_ref.dtype)


def fused_qkv(x_flat, w1_g, wdw_g, mask, H, W):
    B, C, N = x_flat.shape
    P0 = ((W + 1 + 127) // 128) * 128
    flops = int(B * (4 * C * C * N + 2 * C * N * 22))
    bytes_acc = int(B * (C * N * 2 + 2 * C * N * 2)
                    + 2 * C * C * 2 + 2 * 9 * C * 4 + 2 * N * 4)
    return pl.pallas_call(
        functools.partial(_qkv_kernel, W=W, P0=P0),
        out_shape=jax.ShapeDtypeStruct((B, 2, C, N), jnp.bfloat16),
        grid=(B, 2),
        in_specs=[pl.BlockSpec((1, C, N), lambda b, g: (b, 0, 0)),
                  pl.BlockSpec((1, C, C), lambda b, g: (g, 0, 0)),
                  pl.BlockSpec((1, 9, C, 1), lambda b, g: (g, 0, 0, 0)),
                  pl.BlockSpec((2, N), lambda b, g: (0, 0))],
        out_specs=pl.BlockSpec((1, 1, C, N), lambda b, g: (b, g, 0, 0)),
        scratch_shapes=[pltpu.VMEM((C, N + 2 * P0), jnp.bfloat16)],
        compiler_params=pltpu.CompilerParams(
            dimension_semantics=("parallel", "parallel"),
            vmem_limit_bytes=48 * 1024 * 1024),
        cost_estimate=pl.CostEstimate(flops=flops, transcendentals=0,
                                      bytes_accessed=bytes_acc),
    )(x_flat, w1_g, wdw_g, mask)


# ----------------------------------------------------------------------------
# Kernel 2: SSL (db3 DWT -> depthwise convs on sub-bands -> inverse DWT),
#           grid (B, C): one channel per step, dense shared DWT matrices.
# ----------------------------------------------------------------------------
def _ssl_kernel(x_ref, ah_ref, awt_ref, sh_ref, swt_ref, w_ref, o_ref, *, oh, ow):
    # x:  (1, 1, H, W) bf16      ah: (2*ohp, H) bf16      awt: (W, 2*owp) bf16
    # sh: (2, Hout, oh) bf16     swt: (2, ow, Wout) bf16  w: SMEM (C, 27) f32
    # o:  (1, 1, Hout, Wout) bf16
    c = pl.program_id(1)
    ohp = oh + 2
    owp = ow + 2
    x = x_ref[0, 0]                                                     # (H, W)
    t = jnp.dot(ah_ref[...], x, preferred_element_type=jnp.float32)     # (2ohp, W)
    u = jnp.dot(t.astype(jnp.bfloat16), awt_ref[...],
                preferred_element_type=jnp.float32)                     # (2ohp, 2owp)

    def dw3(band, widx):   # 3x3 depthwise conv on one zero-bordered sub-band
        acc = None
        for dy in range(3):
            for dx in range(3):
                wgt = w_ref[c, widx * 9 + dy * 3 + dx]
                v = wgt * band[dy:dy + oh, dx:dx + ow]
                acc = v if acc is None else acc + v
        return acc.astype(jnp.bfloat16)

    cll = dw3(u[0:ohp, 0:owp], 0)          # LL                 -> conv5
    clh = dw3(u[ohp:2 * ohp, 0:owp], 0)    # band 0 (hi-h lo-w) -> conv5
    chl = dw3(u[0:ohp, owp:2 * owp], 1)    # band 1 (lo-h hi-w) -> conv7
    chh = dw3(u[ohp:2 * ohp, owp:2 * owp], 2)   # band 2 (hh)   -> conv9

    lo = (jnp.dot(sh_ref[0], cll, preferred_element_type=jnp.float32)
          + jnp.dot(sh_ref[1], clh, preferred_element_type=jnp.float32))  # (Hout, ow)
    hi = (jnp.dot(sh_ref[0], chl, preferred_element_type=jnp.float32)
          + jnp.dot(sh_ref[1], chh, preferred_element_type=jnp.float32))
    y = (jnp.dot(lo.astype(jnp.bfloat16), swt_ref[0], preferred_element_type=jnp.float32)
         + jnp.dot(hi.astype(jnp.bfloat16), swt_ref[1], preferred_element_type=jnp.float32))
    o_ref[0, 0] = y.astype(o_ref.dtype)


def ssl_forward(x4, w5, w7, w9, C, H, W):
    # NOTE: SSL.conv1 / SSL.conv_cat exist in the reference __init__ but are
    # unused by its forward(), so they are not materialized here.
    B = x4.shape[0]
    AH, AWT, SH, SWT, oh, ow, Hout, Wout = _ssl_matrices(H, W)
    ohp, owp = oh + 2, ow + 2
    ah = jnp.asarray(AH, dtype=jnp.bfloat16)
    awt = jnp.asarray(AWT, dtype=jnp.bfloat16)
    sh = jnp.asarray(SH, dtype=jnp.bfloat16)
    swt = jnp.asarray(SWT, dtype=jnp.bfloat16)
    # per-channel depthwise weights as SMEM scalars: [conv5 | conv7 | conv9]
    w_all = jnp.concatenate([w5.reshape(C, 9), w7.reshape(C, 9),
                             w9.reshape(C, 9)], axis=1).astype(jnp.float32)
    mat_flops = 2 * (2 * ohp * H * W + 2 * ohp * W * 2 * owp
                     + 4 * Hout * oh * ow + 2 * Hout * ow * Wout)
    flops = int(B * C * (mat_flops + 4 * 9 * 2 * oh * ow))
    bytes_acc = int(B * C * (H * W + Hout * Wout) * 2
                    + (AH.size + AWT.size + SH.size + SWT.size) * 2 + C * 27 * 4)
    return pl.pallas_call(
        functools.partial(_ssl_kernel, oh=oh, ow=ow),
        out_shape=jax.ShapeDtypeStruct((B, C, Hout, Wout), jnp.bfloat16),
        grid=(B, C),
        in_specs=[pl.BlockSpec((1, 1, H, W), lambda b, c: (b, c, 0, 0)),
                  pl.BlockSpec((2 * ohp, H), lambda b, c: (0, 0)),
                  pl.BlockSpec((W, 2 * owp), lambda b, c: (0, 0)),
                  pl.BlockSpec((2, Hout, oh), lambda b, c: (0, 0, 0)),
                  pl.BlockSpec((2, ow, Wout), lambda b, c: (0, 0, 0)),
                  pl.BlockSpec(memory_space=pltpu.MemorySpace.SMEM)],
        out_specs=pl.BlockSpec((1, 1, Hout, Wout), lambda b, c: (b, c, 0, 0)),
        compiler_params=pltpu.CompilerParams(
            dimension_semantics=("parallel", "parallel"),
            vmem_limit_bytes=48 * 1024 * 1024),
        cost_estimate=pl.CostEstimate(flops=flops, transcendentals=0,
                                      bytes_accessed=bytes_acc),
    )(x4, ah, awt, sh, swt, w_all)


# ----------------------------------------------------------------------------
# Kernel 3a: attention stats — full-C gram + per-row sum-of-squares,
#            accumulated over N tiles (grid (B, NT), NT is a reduction axis).
# ----------------------------------------------------------------------------
def _attn_stats_kernel(q_ref, k_ref, g_ref, sqq_ref, sqk_ref):
    @pl.when(pl.program_id(1) == 0)
    def _():
        g_ref[...] = jnp.zeros_like(g_ref)
        sqq_ref[...] = jnp.zeros_like(sqq_ref)
        sqk_ref[...] = jnp.zeros_like(sqk_ref)

    q = q_ref[0]          # (C, TN) bf16
    k = k_ref[0, 0]       # (C, TN) bf16
    g_ref[0] += jax.lax.dot_general(q, k, (((1,), (1,)), ((), ())),
                                    preferred_element_type=jnp.float32)
    qf = q.astype(jnp.float32)
    kf = k.astype(jnp.float32)
    sqq_ref[0] += jnp.sum(qf * qf, axis=-1, keepdims=True)
    sqk_ref[0] += jnp.sum(kf * kf, axis=-1, keepdims=True)


def _pick_tile(n, target=2048):
    if n <= target:
        return n
    t = target
    while t > 128 and n % t:
        t //= 2
    return t if n % t == 0 else n


def attn_stats(q, kv):
    B, C, N = q.shape
    tn = _pick_tile(N)
    nt = N // tn
    flops = int(B * (2 * C * C * N + 6 * C * N))
    bytes_acc = int(B * (2 * C * N * 2 + (C * C + 2 * C) * 4))
    return pl.pallas_call(
        _attn_stats_kernel,
        out_shape=(jax.ShapeDtypeStruct((B, C, C), jnp.float32),
                   jax.ShapeDtypeStruct((B, C, 1), jnp.float32),
                   jax.ShapeDtypeStruct((B, C, 1), jnp.float32)),
        grid=(B, nt),
        in_specs=[pl.BlockSpec((1, C, tn), lambda b, t: (b, 0, t)),
                  pl.BlockSpec((1, 1, C, tn), lambda b, t: (b, 0, 0, t))],
        out_specs=(pl.BlockSpec((1, C, C), lambda b, t: (b, 0, 0)),
                   pl.BlockSpec((1, C, 1), lambda b, t: (b, 0, 0)),
                   pl.BlockSpec((1, C, 1), lambda b, t: (b, 0, 0))),
        compiler_params=pltpu.CompilerParams(
            dimension_semantics=("parallel", "arbitrary"),
            vmem_limit_bytes=48 * 1024 * 1024),
        cost_estimate=pl.CostEstimate(flops=flops, transcendentals=0,
                                      bytes_accessed=bytes_acc),
    )(q, kv)


# ----------------------------------------------------------------------------
# Kernel 3b: block-diagonal softmax + fused projection, grid (B, NT) parallel.
# ----------------------------------------------------------------------------
def _attn_apply_kernel(g_ref, rs_ref, cs_ref, bias_ref, wp_ref, v_ref, o_ref):
    # g: (1,C,C) f32  rs: (1,C,1) f32 (rsqrt(q sumsq) * temperature)
    # cs: (1,1,C) f32 (rsqrt(k sumsq))  bias: (C,C) f32 (0 / -1e30 head mask)
    # wp: (C,C) f32   v: (1,1,C,TN) bf16   o: (1,C,TN)
    logits = g_ref[0] * rs_ref[0] * cs_ref[0] + bias_ref[...]
    logits = logits - jnp.max(logits, axis=-1, keepdims=True)
    e = jnp.exp(logits)
    a = e / jnp.sum(e, axis=-1, keepdims=True)        # exact (torch parity)
    # project_out folded in: out = Wp @ (A @ V) = (Wp @ A) @ V
    m = jnp.dot(wp_ref[...], a, preferred_element_type=jnp.float32)      # (C, C)
    out = jnp.dot(m.astype(jnp.bfloat16), v_ref[0, 0],
                  preferred_element_type=jnp.float32)                    # (C, TN)
    o_ref[0] = out.astype(o_ref.dtype)


def attn_apply(g, rs, cs, bias, wp, kv, out_dtype):
    B, C, _ = g.shape
    N = kv.shape[3]
    tn = _pick_tile(N)
    nt = N // tn
    flops = int(B * 2 * C * C * N + B * nt * (2 * C * C * C + 8 * C * C))
    bytes_acc = int(B * (C * N * 2 + C * N * 4 + 2 * C * C * 4))
    trans = int(B * nt * C * C)
    return pl.pallas_call(
        _attn_apply_kernel,
        out_shape=jax.ShapeDtypeStruct((B, C, N), out_dtype),
        grid=(B, nt),
        in_specs=[pl.BlockSpec((1, C, C), lambda b, t: (b, 0, 0)),
                  pl.BlockSpec((1, C, 1), lambda b, t: (b, 0, 0)),
                  pl.BlockSpec((1, 1, C), lambda b, t: (b, 0, 0)),
                  pl.BlockSpec((C, C), lambda b, t: (0, 0)),
                  pl.BlockSpec((C, C), lambda b, t: (0, 0)),
                  pl.BlockSpec((1, 1, C, tn), lambda b, t: (b, 1, 0, t))],
        out_specs=pl.BlockSpec((1, C, tn), lambda b, t: (b, 0, t)),
        compiler_params=pltpu.CompilerParams(
            dimension_semantics=("parallel", "parallel"),
            vmem_limit_bytes=48 * 1024 * 1024),
        cost_estimate=pl.CostEstimate(flops=flops, transcendentals=trans,
                                      bytes_accessed=bytes_acc),
    )(g, rs, cs, bias, wp, kv)


# ----------------------------------------------------------------------------
# MDTA forward (glue)
# ----------------------------------------------------------------------------
def mdta_forward(x, params, num_heads):
    B, C, H, W = x.shape
    assert H % 2 == 0 and W % 2 == 0, "db3/J=1/zero mode needs even H, W here"
    assert C % num_heads == 0
    N = H * W
    d = C // num_heads
    x_bf = x.astype(jnp.bfloat16)

    # --- k, v path: fused 1x1 conv + depthwise 3x3 conv ----------------------
    w1_g = params['w_qkv'].astype(jnp.bfloat16).reshape(2, C, C)
    wdw_g = params['w_qkv_dw'].reshape(2, C, 9).transpose(0, 2, 1)[..., None]
    col = np.arange(N) % W
    mask = jnp.asarray(np.stack([(col != 0), (col != W - 1)]).astype(np.float32))
    kv = fused_qkv(x_bf.reshape(B, C, N), w1_g, wdw_g, mask, H, W)   # (B,2,C,N)

    # --- q path: SSL (native NCHW layout, no wrapper transposes) -------------
    q4 = ssl_forward(x_bf, params['w_ssl_conv5'], params['w_ssl_conv7'],
                     params['w_ssl_conv9'], C, H, W)                 # (B,C,H,W)
    assert q4.shape[2] * q4.shape[3] == N
    q = q4.reshape(B, C, N)

    # --- attention stats: per-row sum-of-squares + full-C gram over N --------
    g, sqq, sqk = attn_stats(q, kv)

    # Tiny per-batch (C,)-sized glue: F.normalize folded into row/column scales
    # of the gram; temperature folded into the row scale.
    eps2 = jnp.float32(1e-24)                       # == F.normalize eps (1e-12)^2
    temp_col = jnp.repeat(params['temperature'].reshape(num_heads), d)
    rs = jax.lax.rsqrt(jnp.maximum(sqq, eps2)) * temp_col.reshape(1, C, 1)
    cs = jnp.transpose(jax.lax.rsqrt(jnp.maximum(sqk, eps2)), (0, 2, 1))
    head = np.arange(C) // d
    bias = jnp.asarray(np.where(head[:, None] == head[None, :],
                                0.0, -1e30).astype(np.float32))

    out = attn_apply(g, rs, cs, bias, params['w_proj'].astype(jnp.float32),
                     kv, x.dtype)                                    # (B, C, N)
    return out.reshape(B, C, H, W)


def init_params(key, channels, num_heads):
    ks = jax.random.split(key, 6)

    def w(k, shape, fan_in):
        return jax.random.normal(k, shape, jnp.float32) / np.sqrt(float(fan_in))

    return {
        'w_qkv': w(ks[0], (2 * channels, channels), channels),      # 1x1, no bias
        'w_qkv_dw': w(ks[1], (2 * channels, 3, 3), 9),              # depthwise 3x3
        'w_proj': w(ks[2], (channels, channels), channels),         # 1x1, no bias
        'w_ssl_conv5': w(ks[3], (channels, 3, 3), 9),
        'w_ssl_conv7': w(ks[4], (channels, 3, 3), 9),
        'w_ssl_conv9': w(ks[5], (channels, 3, 3), 9),
        'temperature': jnp.ones((1, num_heads, 1, 1), jnp.float32),
    }


if __name__ == "__main__":
    B, C, H, W = 2, 4, 16, 16
    num_heads = 2
    key = jax.random.PRNGKey(0)
    kx, kp = jax.random.split(key)
    x = jax.random.normal(kx, (B, C, H, W), jnp.float32)
    params = init_params(kp, C, num_heads)

    fwd = jax.jit(mdta_forward, static_argnums=2)
    out = fwd(x, params, num_heads)
    out = jax.block_until_ready(out)
    assert out.shape == (B, C, H, W)
    assert bool(jnp.all(jnp.isfinite(out)))
    print("KERNEL_OK")
</pallas_src>

<mosaic_0001>
module attributes {stable_mosaic.version = 11 : i64} {
  func.func @_ssl_kernel(%arg0: i32, %arg1: i32, %arg2: memref<1x1x16x16xbf16, #tpu.memory_space<vmem>>, %arg3: memref<24x16xbf16, #tpu.memory_space<vmem>>, %arg4: memref<16x24xbf16, #tpu.memory_space<vmem>>, %arg5: memref<2x16x10xbf16, #tpu.memory_space<vmem>>, %arg6: memref<2x10x16xbf16, #tpu.memory_space<vmem>>, %arg7: memref<4x27xf32, #tpu.memory_space<smem>>, %arg8: memref<1x1x16x16xbf16, #tpu.memory_space<vmem>>) attributes {dimension_semantics = [#tpu.dimension_semantics<parallel>, #tpu.dimension_semantics<parallel>], iteration_bounds = array<i64: 2, 4>, scalar_prefetch = 0 : i64, scratch_operands = 0 : i64, tpu.core_type = #tpu.core_type<tc>, window_params = [{transform_indices = @transform_0, window_bounds = array<i64: 1, 1, 16, 16>}, {pipeline_mode = #tpu.pipeline_mode<synchronous>, transform_indices = @transform_1, window_bounds = array<i64: 24, 16>}, {pipeline_mode = #tpu.pipeline_mode<synchronous>, transform_indices = @transform_2, window_bounds = array<i64: 16, 24>}, {pipeline_mode = #tpu.pipeline_mode<synchronous>, transform_indices = @transform_3, window_bounds = array<i64: 2, 16, 10>}, {pipeline_mode = #tpu.pipeline_mode<synchronous>, transform_indices = @transform_4, window_bounds = array<i64: 2, 10, 16>}, {transform_indices = @transform_5, window_bounds = array<i64: 4, 27>}, {transform_indices = @transform_6, window_bounds = array<i64: 1, 1, 16, 16>}]} {
    %c0 = arith.constant 0 : index
    %c0_0 = arith.constant 0 : index
    %c0_1 = arith.constant 0 : index
    %c0_2 = arith.constant 0 : index
    %0 = vector.load %arg2[%c0, %c0_0, %c0_1, %c0_2] : memref<1x1x16x16xbf16, #tpu.memory_space<vmem>>, vector<1x1x16x16xbf16>
    %1 = vector.shape_cast %0 : vector<1x1x16x16xbf16> to vector<16x16xbf16>
    %c0_3 = arith.constant 0 : index
    %c0_4 = arith.constant 0 : index
    %2 = vector.load %arg3[%c0_3, %c0_4] : memref<24x16xbf16, #tpu.memory_space<vmem>>, vector<24x16xbf16>
    %cst = arith.constant dense<0.000000e+00> : vector<24x16xf32>
    %3 = tpu.matmul %2, %1, %cst {dimension_numbers = #tpu.dot_dimension_numbers<[1], [0], [0], [1], [0, 0, 1, 1], [], []>} : vector<24x16xbf16>, vector<16x16xbf16>, vector<24x16xf32> -> vector<24x16xf32>
    %4 = arith.truncf %3 : vector<24x16xf32> to vector<24x16xbf16>
    %c0_5 = arith.constant 0 : index
    %c0_6 = arith.constant 0 : index
    %5 = vector.load %arg4[%c0_5, %c0_6] : memref<16x24xbf16, #tpu.memory_space<vmem>>, vector<16x24xbf16>
    %cst_7 = arith.constant dense<0.000000e+00> : vector<24x24xf32>
    %6 = tpu.matmul %4, %5, %cst_7 {dimension_numbers = #tpu.dot_dimension_numbers<[1], [0], [0], [1], [0, 0, 1, 1], [], []>} : vector<24x16xbf16>, vector<16x24xbf16>, vector<24x24xf32> -> vector<24x24xf32>
    %7 = vector.extract_strided_slice %6 {offsets = [0, 0], sizes = [12, 12], strides = [1, 1]} : vector<24x24xf32> to vector<12x12xf32>
    %8 = arith.index_cast %arg1 : i32 to index
    %c0_8 = arith.constant 0 : index
    %9 = memref.load %arg7[%8, %c0_8] : memref<4x27xf32, #tpu.memory_space<smem>>
    %10 = vector.extract_strided_slice %7 {offsets = [0, 0], sizes = [10, 10], strides = [1, 1]} : vector<12x12xf32> to vector<10x10xf32>
    %11 = vector.broadcast %9 : f32 to vector<10x10xf32>
    %12 = arith.mulf %11, %10 : vector<10x10xf32>
    %13 = arith.index_cast %arg1 : i32 to index
    %c1 = arith.constant 1 : index
    %14 = memref.load %arg7[%13, %c1] : memref<4x27xf32, #tpu.memory_space<smem>>
    %15 = vector.extract_strided_slice %7 {offsets = [0, 1], sizes = [10, 10], strides = [1, 1]} : vector<12x12xf32> to vector<10x10xf32>
    %16 = vector.broadcast %14 : f32 to vector<10x10xf32>
    %17 = arith.mulf %16, %15 : vector<10x10xf32>
    %18 = arith.addf %12, %17 : vector<10x10xf32>
    %19 = arith.index_cast %arg1 : i32 to index
    %c2 = arith.constant 2 : index
    %20 = memref.load %arg7[%19, %c2] : memref<4x27xf32, #tpu.memory_space<smem>>
    %21 = vector.extract_strided_slice %7 {offsets = [0, 2], sizes = [10, 10], strides = [1, 1]} : vector<12x12xf32> to vector<10x10xf32>
    %22 = vector.broadcast %20 : f32 to vector<10x10xf32>
    %23 = arith.mulf %22, %21 : vector<10x10xf32>
    %24 = arith.addf %18, %23 : vector<10x10xf32>
    %25 = arith.index_cast %arg1 : i32 to index
    %c3 = arith.constant 3 : index
    %26 = memref.load %arg7[%25, %c3] : memref<4x27xf32, #tpu.memory_space<smem>>
    %27 = vector.extract_strided_slice %7 {offsets = [1, 0], sizes = [10, 10], strides = [1, 1]} : vector<12x12xf32> to vector<10x10xf32>
    %28 = vector.broadcast %26 : f32 to vector<10x10xf32>
    %29 = arith.mulf %28, %27 : vector<10x10xf32>
    %30 = arith.addf %24, %29 : vector<10x10xf32>
    %31 = arith.index_cast %arg1 : i32 to index
    %c4 = arith.constant 4 : index
    %32 = memref.load %arg7[%31, %c4] : memref<4x27xf32, #tpu.memory_space<smem>>
    %33 = vector.extract_strided_slice %7 {offsets = [1, 1], sizes = [10, 10], strides = [1, 1]} : vector<12x12xf32> to vector<10x10xf32>
    %34 = vector.broadcast %32 : f32 to vector<10x10xf32>
    %35 = arith.mulf %34, %33 : vector<10x10xf32>
    %36 = arith.addf %30, %35 : vector<10x10xf32>
    %37 = arith.index_cast %arg1 : i32 to index
    %c5 = arith.constant 5 : index
    %38 = memref.load %arg7[%37, %c5] : memref<4x27xf32, #tpu.memory_space<smem>>
    %39 = vector.extract_strided_slice %7 {offsets = [1, 2], sizes = [10, 10], strides = [1, 1]} : vector<12x12xf32> to vector<10x10xf32>
    %40 = vector.broadcast %38 : f32 to vector<10x10xf32>
    %41 = arith.mulf %40, %39 : vector<10x10xf32>
    %42 = arith.addf %36, %41 : vector<10x10xf32>
    %43 = arith.index_cast %arg1 : i32 to index
    %c6 = arith.constant 6 : index
    %44 = memref.load %arg7[%43, %c6] : memref<4x27xf32, #tpu.memory_space<smem>>
    %45 = vector.extract_strided_slice %7 {offsets = [2, 0], sizes = [10, 10], strides = [1, 1]} : vector<12x12xf32> to vector<10x10xf32>
    %46 = vector.broadcast %44 : f32 to vector<10x10xf32>
    %47 = arith.mulf %46, %45 : vector<10x10xf32>
    %48 = arith.addf %42, %47 : vector<10x10xf32>
    %49 = arith.index_cast %arg1 : i32 to index
    %c7 = arith.constant 7 : index
    %50 = memref.load %arg7[%49, %c7] : memref<4x27xf32, #tpu.memory_space<smem>>
    %51 = vector.extract_strided_slice %7 {offsets = [2, 1], sizes = [10, 10], strides = [1, 1]} : vector<12x12xf32> to vector<10x10xf32>
    %52 = vector.broadcast %50 : f32 to vector<10x10xf32>
    %53 = arith.mulf %52, %51 : vector<10x10xf32>
    %54 = arith.addf %48, %53 : vector<10x10xf32>
    %55 = arith.index_cast %arg1 : i32 to index
    %c8 = arith.constant 8 : index
    %56 = memref.load %arg7[%55, %c8] : memref<4x27xf32, #tpu.memory_space<smem>>
    %57 = vector.extract_strided_slice %7 {offsets = [2, 2], sizes = [10, 10], strides = [1, 1]} : vector<12x12xf32> to vector<10x10xf32>
    %58 = vector.broadcast %56 : f32 to vector<10x10xf32>
    %59 = arith.mulf %58, %57 : vector<10x10xf32>
    %60 = arith.addf %54, %59 : vector<10x10xf32>
    %61 = arith.truncf %60 : vector<10x10xf32> to vector<10x10xbf16>
    %62 = vector.extract_strided_slice %6 {offsets = [12, 0], sizes = [12, 12], strides = [1, 1]} : vector<24x24xf32> to vector<12x12xf32>
    %63 = arith.index_cast %arg1 : i32 to index
    %c0_9 = arith.constant 0 : index
    %64 = memref.load %arg7[%63, %c0_9] : memref<4x27xf32, #tpu.memory_space<smem>>
    %65 = vector.extract_strided_slice %62 {offsets = [0, 0], sizes = [10, 10], strides = [1, 1]} : vector<12x12xf32> to vector<10x10xf32>
    %66 = vector.broadcast %64 : f32 to vector<10x10xf32>
    %67 = arith.mulf %66, %65 : vector<10x10xf32>
    %68 = arith.index_cast %arg1 : i32 to index
    %c1_10 = arith.constant 1 : index
    %69 = memref.load %arg7[%68, %c1_10] : memref<4x27xf32, #tpu.memory_space<smem>>
    %70 = vector.extract_strided_slice %62 {offsets = [0, 1], sizes = [10, 10], strides = [1, 1]} : vector<12x12xf32> to vector<10x10xf32>
    %71 = vector.broadcast %69 : f32 to vector<10x10xf32>
    %72 = arith.mulf %71, %70 : vector<10x10xf32>
    %73 = arith.addf %67, %72 : vector<10x10xf32>
    %74 = arith.index_cast %arg1 : i32 to index
    %c2_11 = arith.constant 2 : index
    %75 = memref.load %arg7[%74, %c2_11] : memref<4x27xf32, #tpu.memory_space<smem>>
    %76 = vector.extract_strided_slice %62 {offsets = [0, 2], sizes = [10, 10], strides = [1, 1]} : vector<12x12xf32> to vector<10x10xf32>
    %77 = vector.broadcast %75 : f32 to vector<10x10xf32>
    %78 = arith.mulf %77, %76 : vector<10x10xf32>
    %79 = arith.addf %73, %78 : vector<10x10xf32>
    %80 = arith.index_cast %arg1 : i32 to index
    %c3_12 = arith.constant 3 : index
    %81 = memref.load %arg7[%80, %c3_12] : memref<4x27xf32, #tpu.memory_space<smem>>
    %82 = vector.extract_strided_slice %62 {offsets = [1, 0], sizes = [10, 10], strides = [1, 1]} : vector<12x12xf32> to vector<10x10xf32>
    %83 = vector.broadcast %81 : f32 to vector<10x10xf32>
    %84 = arith.mulf %83, %82 : vector<10x10xf32>
    %85 = arith.addf %79, %84 : vector<10x10xf32>
    %86 = arith.index_cast %arg1 : i32 to index
    %c4_13 = arith.constant 4 : index
    %87 = memref.load %arg7[%86, %c4_13] : memref<4x27xf32, #tpu.memory_space<smem>>
    %88 = vector.extract_strided_slice %62 {offsets = [1, 1], sizes = [10, 10], strides = [1, 1]} : vector<12x12xf32> to vector<10x10xf32>
    %89 = vector.broadcast %87 : f32 to vector<10x10xf32>
    %90 = arith.mulf %89, %88 : vector<10x10xf32>
    %91 = arith.addf %85, %90 : vector<10x10xf32>
    %92 = arith.index_cast %arg1 : i32 to index
    %c5_14 = arith.constant 5 : index
    %93 = memref.load %arg7[%92, %c5_14] : memref<4x27xf32, #tpu.memory_space<smem>>
    %94 = vector.extract_strided_slice %62 {offsets = [1, 2], sizes = [10, 10], strides = [1, 1]} : vector<12x12xf32> to vector<10x10xf32>
    %95 = vector.broadcast %93 : f32 to vector<10x10xf32>
    %96 = arith.mulf %95, %94 : vector<10x10xf32>
    %97 = arith.addf %91, %96 : vector<10x10xf32>
    %98 = arith.index_cast %arg1 : i32 to index
    %c6_15 = arith.constant 6 : index
    %99 = memref.load %arg7[%98, %c6_15] : memref<4x27xf32, #tpu.memory_space<smem>>
    %100 = vector.extract_strided_slice %62 {offsets = [2, 0], sizes = [10, 10], strides = [1, 1]} : vector<12x12xf32> to vector<10x10xf32>
    %101 = vector.broadcast %99 : f32 to vector<10x10xf32>
    %102 = arith.mulf %101, %100 : vector<10x10xf32>
    %103 = arith.addf %97, %102 : vector<10x10xf32>
    %104 = arith.index_cast %arg1 : i32 to index
    %c7_16 = arith.constant 7 : index
    %105 = memref.load %arg7[%104, %c7_16] : memref<4x27xf32, #tpu.memory_space<smem>>
    %106 = vector.extract_strided_slice %62 {offsets = [2, 1], sizes = [10, 10], strides = [1, 1]} : vector<12x12xf32> to vector<10x10xf32>
    %107 = vector.broadcast %105 : f32 to vector<10x10xf32>
    %108 = arith.mulf %107, %106 : vector<10x10xf32>
    %109 = arith.addf %103, %108 : vector<10x10xf32>
    %110 = arith.index_cast %arg1 : i32 to index
    %c8_17 = arith.constant 8 : index
    %111 = memref.load %arg7[%110, %c8_17] : memref<4x27xf32, #tpu.memory_space<smem>>
    %112 = vector.extract_strided_slice %62 {offsets = [2, 2], sizes = [10, 10], strides = [1, 1]} : vector<12x12xf32> to vector<10x10xf32>
    %113 = vector.broadcast %111 : f32 to vector<10x10xf32>
    %114 = arith.mulf %113, %112 : vector<10x10xf32>
    %115 = arith.addf %109, %114 : vector<10x10xf32>
    %116 = arith.truncf %115 : vector<10x10xf32> to vector<10x10xbf16>
    %117 = vector.extract_strided_slice %6 {offsets = [0, 12], sizes = [12, 12], strides = [1, 1]} : vector<24x24xf32> to vector<12x12xf32>
    %118 = arith.index_cast %arg1 : i32 to index
    %c9 = arith.constant 9 : index
    %119 = memref.load %arg7[%118, %c9] : memref<4x27xf32, #tpu.memory_space<smem>>
    %120 = vector.extract_strided_slice %117 {offsets = [0, 0], sizes = [10, 10], strides = [1, 1]} : vector<12x12xf32> to vector<10x10xf32>
    %121 = vector.broadcast %119 : f32 to vector<10x10xf32>
    %122 = arith.mulf %121, %120 : vector<10x10xf32>
    %123 = arith.index_cast %arg1 : i32 to index
    %c10 = arith.constant 10 : index
    %124 = memref.load %arg7[%123, %c10] : memref<4x27xf32, #tpu.memory_space<smem>>
    %125 = vector.extract_strided_slice %117 {offsets = [0, 1], sizes = [10, 10], strides = [1, 1]} : vector<12x12xf32> to vector<10x10xf32>
    %126 = vector.broadcast %124 : f32 to vector<10x10xf32>
    %127 = arith.mulf %126, %125 : vector<10x10xf32>
    %128 = arith.addf %122, %127 : vector<10x10xf32>
    %129 = arith.index_cast %arg1 : i32 to index
    %c11 = arith.constant 11 : index
    %130 = memref.load %arg7[%129, %c11] : memref<4x27xf32, #tpu.memory_space<smem>>
    %131 = vector.extract_strided_slice %117 {offsets = [0, 2], sizes = [10, 10], strides = [1, 1]} : vector<12x12xf32> to vector<10x10xf32>
    %132 = vector.broadcast %130 : f32 to vector<10x10xf32>
    %133 = arith.mulf %132, %131 : vector<10x10xf32>
    %134 = arith.addf %128, %133 : vector<10x10xf32>
    %135 = arith.index_cast %arg1 : i32 to index
    %c12 = arith.constant 12 : index
    %136 = memref.load %arg7[%135, %c12] : memref<4x27xf32, #tpu.memory_space<smem>>
    %137 = vector.extract_strided_slice %117 {offsets = [1, 0], sizes = [10, 10], strides = [1, 1]} : vector<12x12xf32> to vector<10x10xf32>
    %138 = vector.broadcast %136 : f32 to vector<10x10xf32>
    %139 = arith.mulf %138, %137 : vector<10x10xf32>
    %140 = arith.addf %134, %139 : vector<10x10xf32>
    %141 = arith.index_cast %arg1 : i32 to index
    %c13 = arith.constant 13 : index
    %142 = memref.load %arg7[%141, %c13] : memref<4x27xf32, #tpu.memory_space<smem>>
    %143 = vector.extract_strided_slice %117 {offsets = [1, 1], sizes = [10, 10], strides = [1, 1]} : vector<12x12xf32> to vector<10x10xf32>
    %144 = vector.broadcast %142 : f32 to vector<10x10xf32>
    %145 = arith.mulf %144, %143 : vector<10x10xf32>
    %146 = arith.addf %140, %145 : vector<10x10xf32>
    %147 = arith.index_cast %arg1 : i32 to index
    %c14 = arith.constant 14 : index
    %148 = memref.load %arg7[%147, %c14] : memref<4x27xf32, #tpu.memory_space<smem>>
    %149 = vector.extract_strided_slice %117 {offsets = [1, 2], sizes = [10, 10], strides = [1, 1]} : vector<12x12xf32> to vector<10x10xf32>
    %150 = vector.broadcast %148 : f32 to vector<10x10xf32>
    %151 = arith.mulf %150, %149 : vector<10x10xf32>
    %152 = arith.addf %146, %151 : vector<10x10xf32>
    %153 = arith.index_cast %arg1 : i32 to index
    %c15 = arith.constant 15 : index
    %154 = memref.load %arg7[%153, %c15] : memref<4x27xf32, #tpu.memory_space<smem>>
    %155 = vector.extract_strided_slice %117 {offsets = [2, 0], sizes = [10, 10], strides = [1, 1]} : vector<12x12xf32> to vector<10x10xf32>
    %156 = vector.broadcast %154 : f32 to vector<10x10xf32>
    %157 = arith.mulf %156, %155 : vector<10x10xf32>
    %158 = arith.addf %152, %157 : vector<10x10xf32>
    %159 = arith.index_cast %arg1 : i32 to index
    %c16 = arith.constant 16 : index
    %160 = memref.load %arg7[%159, %c16] : memref<4x27xf32, #tpu.memory_space<smem>>
    %161 = vector.extract_strided_slice %117 {offsets = [2, 1], sizes = [10, 10], strides = [1, 1]} : vector<12x12xf32> to vector<10x10xf32>
    %162 = vector.broadcast %160 : f32 to vector<10x10xf32>
    %163 = arith.mulf %162, %161 : vector<10x10xf32>
    %164 = arith.addf %158, %163 : vector<10x10xf32>
    %165 = arith.index_cast %arg1 : i32 to index
    %c17 = arith.constant 17 : index
    %166 = memref.load %arg7[%165, %c17] : memref<4x27xf32, #tpu.memory_space<smem>>
    %167 = vector.extract_strided_slice %117 {offsets = [2, 2], sizes = [10, 10], strides = [1, 1]} : vector<12x12xf32> to vector<10x10xf32>
    %168 = vector.broadcast %166 : f32 to vector<10x10xf32>
    %169 = arith.mulf %168, %167 : vector<10x10xf32>
    %170 = arith.addf %164, %169 : vector<10x10xf32>
    %171 = arith.truncf %170 : vector<10x10xf32> to vector<10x10xbf16>
    %172 = vector.extract_strided_slice %6 {offsets = [12, 12], sizes = [12, 12], strides = [1, 1]} : vector<24x24xf32> to vector<12x12xf32>
    %173 = arith.index_cast %arg1 : i32 to index
    %c18 = arith.constant 18 : index
    %174 = memref.load %arg7[%173, %c18] : memref<4x27xf32, #tpu.memory_space<smem>>
    %175 = vector.extract_strided_slice %172 {offsets = [0, 0], sizes = [10, 10], strides = [1, 1]} : vector<12x12xf32> to vector<10x10xf32>
    %176 = vector.broadcast %174 : f32 to vector<10x10xf32>
    %177 = arith.mulf %176, %175 : vector<10x10xf32>
    %178 = arith.index_cast %arg1 : i32 to index
    %c19 = arith.constant 19 : index
    %179 = memref.load %arg7[%178, %c19] : memref<4x27xf32, #tpu.memory_space<smem>>
    %180 = vector.extract_strided_slice %172 {offsets = [0, 1], sizes = [10, 10], strides = [1, 1]} : vector<12x12xf32> to vector<10x10xf32>
    %181 = vector.broadcast %179 : f32 to vector<10x10xf32>
    %182 = arith.mulf %181, %180 : vector<10x10xf32>
    %183 = arith.addf %177, %182 : vector<10x10xf32>
    %184 = arith.index_cast %arg1 : i32 to index
    %c20 = arith.constant 20 : index
    %185 = memref.load %arg7[%184, %c20] : memref<4x27xf32, #tpu.memory_space<smem>>
    %186 = vector.extract_strided_slice %172 {offsets = [0, 2], sizes = [10, 10], strides = [1, 1]} : vector<12x12xf32> to vector<10x10xf32>
    %187 = vector.broadcast %185 : f32 to vector<10x10xf32>
    %188 = arith.mulf %187, %186 : vector<10x10xf32>
    %189 = arith.addf %183, %188 : vector<10x10xf32>
    %190 = arith.index_cast %arg1 : i32 to index
    %c21 = arith.constant 21 : index
    %191 = memref.load %arg7[%190, %c21] : memref<4x27xf32, #tpu.memory_space<smem>>
    %192 = vector.extract_strided_slice %172 {offsets = [1, 0], sizes = [10, 10], strides = [1, 1]} : vector<12x12xf32> to vector<10x10xf32>
    %193 = vector.broadcast %191 : f32 to vector<10x10xf32>
    %194 = arith.mulf %193, %192 : vector<10x10xf32>
    %195 = arith.addf %189, %194 : vector<10x10xf32>
    %196 = arith.index_cast %arg1 : i32 to index
    %c22 = arith.constant 22 : index
    %197 = memref.load %arg7[%196, %c22] : memref<4x27xf32, #tpu.memory_space<smem>>
    %198 = vector.extract_strided_slice %172 {offsets = [1, 1], sizes = [10, 10], strides = [1, 1]} : vector<12x12xf32> to vector<10x10xf32>
    %199 = vector.broadcast %197 : f32 to vector<10x10xf32>
    %200 = arith.mulf %199, %198 : vector<10x10xf32>
    %201 = arith.addf %195, %200 : vector<10x10xf32>
    %202 = arith.index_cast %arg1 : i32 to index
    %c23 = arith.constant 23 : index
    %203 = memref.load %arg7[%202, %c23] : memref<4x27xf32, #tpu.memory_space<smem>>
    %204 = vector.extract_strided_slice %172 {offsets = [1, 2], sizes = [10, 10], strides = [1, 1]} : vector<12x12xf32> to vector<10x10xf32>
    %205 = vector.broadcast %203 : f32 to vector<10x10xf32>
    %206 = arith.mulf %205, %204 : vector<10x10xf32>
    %207 = arith.addf %201, %206 : vector<10x10xf32>
    %208 = arith.index_cast %arg1 : i32 to index
    %c24 = arith.constant 24 : index
    %209 = memref.load %arg7[%208, %c24] : memref<4x27xf32, #tpu.memory_space<smem>>
    %210 = vector.extract_strided_slice %172 {offsets = [2, 0], sizes = [10, 10], strides = [1, 1]} : vector<12x12xf32> to vector<10x10xf32>
    %211 = vector.broadcast %209 : f32 to vector<10x10xf32>
    %212 = arith.mulf %211, %210 : vector<10x10xf32>
    %213 = arith.addf %207, %212 : vector<10x10xf32>
    %214 = arith.index_cast %arg1 : i32 to index
    %c25 = arith.constant 25 : index
    %215 = memref.load %arg7[%214, %c25] : memref<4x27xf32, #tpu.memory_space<smem>>
    %216 = vector.extract_strided_slice %172 {offsets = [2, 1], sizes = [10, 10], strides = [1, 1]} : vector<12x12xf32> to vector<10x10xf32>
    %217 = vector.broadcast %215 : f32 to vector<10x10xf32>
    %218 = arith.mulf %217, %216 : vector<10x10xf32>
    %219 = arith.addf %213, %218 : vector<10x10xf32>
    %220 = arith.index_cast %arg1 : i32 to index
    %c26 = arith.constant 26 : index
    %221 = memref.load %arg7[%220, %c26] : memref<4x27xf32, #tpu.memory_space<smem>>
    %222 = vector.extract_strided_slice %172 {offsets = [2, 2], sizes = [10, 10], strides = [1, 1]} : vector<12x12xf32> to vector<10x10xf32>
    %223 = vector.broadcast %221 : f32 to vector<10x10xf32>
    %224 = arith.mulf %223, %222 : vector<10x10xf32>
    %225 = arith.addf %219, %224 : vector<10x10xf32>
    %226 = arith.truncf %225 : vector<10x10xf32> to vector<10x10xbf16>
    %c0_18 = arith.constant 0 : index
    %c0_19 = arith.constant 0 : index
    %c0_20 = arith.constant 0 : index
    %227 = vector.load %arg5[%c0_18, %c0_19, %c0_20] : memref<2x16x10xbf16, #tpu.memory_space<vmem>>, vector<1x16x10xbf16>
    %228 = vector.shape_cast %227 : vector<1x16x10xbf16> to vector<16x10xbf16>
    %cst_21 = arith.constant dense<0.000000e+00> : vector<16x10xf32>
    %229 = tpu.matmul %228, %61, %cst_21 {dimension_numbers = #tpu.dot_dimension_numbers<[1], [0], [0], [1], [0, 0, 1, 1], [], []>} : vector<16x10xbf16>, vector<10x10xbf16>, vector<16x10xf32> -> vector<16x10xf32>
    %c1_22 = arith.constant 1 : index
    %c0_23 = arith.constant 0 : index
    %c0_24 = arith.constant 0 : index
    %230 = vector.load %arg5[%c1_22, %c0_23, %c0_24] : memref<2x16x10xbf16, #tpu.memory_space<vmem>>, vector<1x16x10xbf16>
    %231 = vector.shape_cast %230 : vector<1x16x10xbf16> to vector<16x10xbf16>
    %cst_25 = arith.constant dense<0.000000e+00> : vector<16x10xf32>
    %232 = tpu.matmul %231, %116, %cst_25 {dimension_numbers = #tpu.dot_dimension_numbers<[1], [0], [0], [1], [0, 0, 1, 1], [], []>} : vector<16x10xbf16>, vector<10x10xbf16>, vector<16x10xf32> -> vector<16x10xf32>
    %233 = arith.addf %229, %232 : vector<16x10xf32>
    %c0_26 = arith.constant 0 : index
    %c0_27 = arith.constant 0 : index
    %c0_28 = arith.constant 0 : index
    %234 = vector.load %arg5[%c0_26, %c0_27, %c0_28] : memref<2x16x10xbf16, #tpu.memory_space<vmem>>, vector<1x16x10xbf16>
    %235 = vector.shape_cast %234 : vector<1x16x10xbf16> to vector<16x10xbf16>
    %cst_29 = arith.constant dense<0.000000e+00> : vector<16x10xf32>
    %236 = tpu.matmul %235, %171, %cst_29 {dimension_numbers = #tpu.dot_dimension_numbers<[1], [0], [0], [1], [0, 0, 1, 1], [], []>} : vector<16x10xbf16>, vector<10x10xbf16>, vector<16x10xf32> -> vector<16x10xf32>
    %c1_30 = arith.constant 1 : index
    %c0_31 = arith.constant 0 : index
    %c0_32 = arith.constant 0 : index
    %237 = vector.load %arg5[%c1_30, %c0_31, %c0_32] : memref<2x16x10xbf16, #tpu.memory_space<vmem>>, vector<1x16x10xbf16>
    %238 = vector.shape_cast %237 : vector<1x16x10xbf16> to vector<16x10xbf16>
    %cst_33 = arith.constant dense<0.000000e+00> : vector<16x10xf32>
    %239 = tpu.matmul %238, %226, %cst_33 {dimension_numbers = #tpu.dot_dimension_numbers<[1], [0], [0], [1], [0, 0, 1, 1], [], []>} : vector<16x10xbf16>, vector<10x10xbf16>, vector<16x10xf32> -> vector<16x10xf32>
    %240 = arith.addf %236, %239 : vector<16x10xf32>
    %241 = arith.truncf %233 : vector<16x10xf32> to vector<16x10xbf16>
    %c0_34 = arith.constant 0 : index
    %c0_35 = arith.constant 0 : index
    %c0_36 = arith.constant 0 : index
    %242 = vector.load %arg6[%c0_34, %c0_35, %c0_36] : memref<2x10x16xbf16, #tpu.memory_space<vmem>>, vector<1x10x16xbf16>
    %243 = vector.shape_cast %242 : vector<1x10x16xbf16> to vector<10x16xbf16>
    %cst_37 = arith.constant dense<0.000000e+00> : vector<16x16xf32>
    %244 = tpu.matmul %241, %243, %cst_37 {dimension_numbers = #tpu.dot_dimension_numbers<[1], [0], [0], [1], [0, 0, 1, 1], [], []>} : vector<16x10xbf16>, vector<10x16xbf16>, vector<16x16xf32> -> vector<16x16xf32>
    %245 = arith.truncf %240 : vector<16x10xf32> to vector<16x10xbf16>
    %c1_38 = arith.constant 1 : index
    %c0_39 = arith.constant 0 : index
    %c0_40 = arith.constant 0 : index
    %246 = vector.load %arg6[%c1_38, %c0_39, %c0_40] : memref<2x10x16xbf16, #tpu.memory_space<vmem>>, vector<1x10x16xbf16>
    %247 = vector.shape_cast %246 : vector<1x10x16xbf16> to vector<10x16xbf16>
    %cst_41 = arith.constant dense<0.000000e+00> : vector<16x16xf32>
    %248 = tpu.matmul %245, %247, %cst_41 {dimension_numbers = #tpu.dot_dimension_numbers<[1], [0], [0], [1], [0, 0, 1, 1], [], []>} : vector<16x10xbf16>, vector<10x16xbf16>, vector<16x16xf32> -> vector<16x16xf32>
    %249 = arith.addf %244, %248 : vector<16x16xf32>
    %250 = arith.truncf %249 : vector<16x16xf32> to vector<16x16xbf16>
    %c0_42 = arith.constant 0 : index
    %c0_43 = arith.constant 0 : index
    %c0_44 = arith.constant 0 : index
    %c0_45 = arith.constant 0 : index
    %251 = vector.load %arg8[%c0_42, %c0_43, %c0_44, %c0_45] : memref<1x1x16x16xbf16, #tpu.memory_space<vmem>>, vector<1x1x16x16xbf16>
    %252 = vector.shape_cast %251 : vector<1x1x16x16xbf16> to vector<16x16xbf16>
    %253 = vector.shape_cast %250 : vector<16x16xbf16> to vector<1x1x16x16xbf16>
    tpu.vector_store %arg8[%c0_42, %c0_43, %c0_44, %c0_45], %253 {strides = array<i32>} : memref<1x1x16x16xbf16, #tpu.memory_space<vmem>>, vector<1x1x16x16xbf16>,
    return
  }
  func.func @transform_0(%arg0: i32, %arg1: i32) -> (i32, i32, i32, i32) {
    %c0_i32 = arith.constant 0 : i32
    %c0_i32_0 = arith.constant 0 : i32
    %c0_i32_1 = arith.constant 0 : i32
    return %arg0, %arg1, %c0_i32, %c0_i32_0 : i32, i32, i32, i32
  }
  func.func @transform_1(%arg0: i32, %arg1: i32) -> (i32, i32) {
    %c0_i32 = arith.constant 0 : i32
    %c0_i32_0 = arith.constant 0 : i32
    %c0_i32_1 = arith.constant 0 : i32
    return %c0_i32, %c0_i32_0 : i32, i32
  }
  func.func @transform_2(%arg0: i32, %arg1: i32) -> (i32, i32) {
    %c0_i32 = arith.constant 0 : i32
    %c0_i32_0 = arith.constant 0 : i32
    %c0_i32_1 = arith.constant 0 : i32
    return %c0_i32, %c0_i32_0 : i32, i32
  }
  func.func @transform_3(%arg0: i32, %arg1: i32) -> (i32, i32, i32) {
    %c0_i32 = arith.constant 0 : i32
    %c0_i32_0 = arith.constant 0 : i32
    %c0_i32_1 = arith.constant 0 : i32
    %c0_i32_2 = arith.constant 0 : i32
    return %c0_i32, %c0_i32_0, %c0_i32_1 : i32, i32, i32
  }
  func.func @transform_4(%arg0: i32, %arg1: i32) -> (i32, i32, i32) {
    %c0_i32 = arith.constant 0 : i32
    %c0_i32_0 = arith.constant 0 : i32
    %c0_i32_1 = arith.constant 0 : i32
    %c0_i32_2 = arith.constant 0 : i32
    return %c0_i32, %c0_i32_0, %c0_i32_1 : i32, i32, i32
  }
  func.func @transform_5(%arg0: i32, %arg1: i32) -> (i32, i32) {
    %c0_i32 = arith.constant 0 : i32
    %c0_i32_0 = arith.constant 0 : i32
    %c0_i32_1 = arith.constant 0 : i32
    return %c0_i32, %c0_i32_0 : i32, i32
  }
  func.func @transform_6(%arg0: i32, %arg1: i32) -> (i32, i32, i32, i32) {
    %c0_i32 = arith.constant 0 : i32
    %c0_i32_0 = arith.constant 0 : i32
    %c0_i32_1 = arith.constant 0 : i32
    return %arg0, %arg1, %c0_i32, %c0_i32_0 : i32, i32, i32, i32
  }
}

module attributes {stable_mosaic.version = 11 : i64} {
  func.func @_qkv_kernel(%arg0: i32, %arg1: i32, %arg2: memref<1x4x256xbf16, #tpu.memory_space<vmem>>, %arg3: memref<1x4x4xbf16, #tpu.memory_space<vmem>>, %arg4: memref<1x9x4x1xf32, #tpu.memory_space<vmem>>, %arg5: memref<2x256xf32, #tpu.memory_space<vmem>>, %arg6: memref<1x1x4x256xbf16, #tpu.memory_space<vmem>>, %arg7: memref<4x512xbf16, #tpu.memory_space<vmem>>) attributes {dimension_semantics = [#tpu.dimension_semantics<parallel>, #tpu.dimension_semantics<parallel>], iteration_bounds = array<i64: 2, 2>, scalar_prefetch = 0 : i64, scratch_operands = 1 : i64, tpu.core_type = #tpu.core_type<tc>, window_params = [{transform_indices = @transform_0, window_bounds = array<i64: 1, 4, 256>}, {transform_indices = @transform_1, window_bounds = array<i64: 1, 4, 4>}, {transform_indices = @transform_2, window_bounds = array<i64: 1, 9, 4, 1>}, {pipeline_mode = #tpu.pipeline_mode<synchronous>, transform_indices = @transform_3, window_bounds = array<i64: 2, 256>}, {transform_indices = @transform_4, window_bounds = array<i64: 1, 1, 4, 256>}]} {
    %c0 = arith.constant 0 : index
    %c0_0 = arith.constant 0 : index
    %c0_1 = arith.constant 0 : index
    %0 = vector.load %arg3[%c0, %c0_0, %c0_1] : memref<1x4x4xbf16, #tpu.memory_space<vmem>>, vector<1x4x4xbf16>
    %1 = vector.shape_cast %0 : vector<1x4x4xbf16> to vector<4x4xbf16>
    %c0_2 = arith.constant 0 : index
    %c0_3 = arith.constant 0 : index
    %c0_4 = arith.constant 0 : index
    %2 = vector.load %arg2[%c0_2, %c0_3, %c0_4] : memref<1x4x256xbf16, #tpu.memory_space<vmem>>, vector<1x4x256xbf16>
    %3 = vector.shape_cast %2 : vector<1x4x256xbf16> to vector<4x256xbf16>
    %cst = arith.constant dense<0.000000e+00> : vector<4x256xf32>
    %4 = tpu.matmul %1, %3, %cst {dimension_numbers = #tpu.dot_dimension_numbers<[1], [0], [0], [1], [0, 0, 1, 1], [], []>} : vector<4x4xbf16>, vector<4x256xbf16>, vector<4x256xf32> -> vector<4x256xf32>
    %cst_5 = arith.constant 0.000000e+00 : bf16
    %5 = vector.broadcast %cst_5 : bf16 to vector<4x128xbf16>
    %c0_6 = arith.constant 0 : index
    %c0_7 = arith.constant 0 : index
    %6 = vector.load %arg7[%c0_6, %c0_7] : memref<4x512xbf16, #tpu.memory_space<vmem>>, vector<4x128xbf16>
    tpu.vector_store %arg7[%c0_6, %c0_7], %5 {strides = array<i32>} : memref<4x512xbf16, #tpu.memory_space<vmem>>, vector<4x128xbf16>,
    %cst_8 = arith.constant 0.000000e+00 : bf16
    %7 = vector.broadcast %cst_8 : bf16 to vector<4x128xbf16>
    %c0_9 = arith.constant 0 : index
    %c384 = arith.constant 384 : index
    %8 = vector.load %arg7[%c0_9, %c384] : memref<4x512xbf16, #tpu.memory_space<vmem>>, vector<4x128xbf16>
    tpu.vector_store %arg7[%c0_9, %c384], %7 {strides = array<i32>} : memref<4x512xbf16, #tpu.memory_space<vmem>>, vector<4x128xbf16>,
    %9 = arith.truncf %4 : vector<4x256xf32> to vector<4x256xbf16>
    %c0_10 = arith.constant 0 : index
    %c128 = arith.constant 128 : index
    %10 = vector.load %arg7[%c0_10, %c128] : memref<4x512xbf16, #tpu.memory_space<vmem>>, vector<4x256xbf16>
    tpu.vector_store %arg7[%c0_10, %c128], %9 {strides = array<i32>} : memref<4x512xbf16, #tpu.memory_space<vmem>>, vector<4x256xbf16>,
    %c0_11 = arith.constant 0 : index
    %c0_12 = arith.constant 0 : index
    %11 = vector.load %arg5[%c0_11, %c0_12] : memref<2x256xf32, #tpu.memory_space<vmem>>, vector<1x256xf32>
    %c1 = arith.constant 1 : index
    %c0_13 = arith.constant 0 : index
    %12 = vector.load %arg5[%c1, %c0_13] : memref<2x256xf32, #tpu.memory_space<vmem>>, vector<1x256xf32>
    %c0_14 = arith.constant 0 : index
    %c1_15 = arith.constant 1 : index
    %c0_16 = arith.constant 0 : index
    %c0_17 = arith.constant 0 : index
    %13 = vector.load %arg4[%c0_14, %c1_15, %c0_16, %c0_17] : memref<1x9x4x1xf32, #tpu.memory_space<vmem>>, vector<1x1x4x1xf32>
    %14 = vector.shape_cast %13 : vector<1x1x4x1xf32> to vector<4x1xf32>
    %c0_18 = arith.constant 0 : index
    %c112 = arith.constant 112 : index
    %15 = vector.load %arg7[%c0_18, %c112] : memref<4x512xbf16, #tpu.memory_space<vmem>>, vector<4x256xbf16>
    %16 = arith.extf %15 : vector<4x256xbf16> to vector<4x256xf32>
    %17 = vector.broadcast %14 : vector<4x1xf32> to vector<4x256xf32>
    %18 = arith.mulf %17, %16 : vector<4x256xf32>
    %c0_19 = arith.constant 0 : index
    %c4 = arith.constant 4 : index
    %c0_20 = arith.constant 0 : index
    %c0_21 = arith.constant 0 : index
    %19 = vector.load %arg4[%c0_19, %c4, %c0_20, %c0_21] : memref<1x9x4x1xf32, #tpu.memory_space<vmem>>, vector<1x1x4x1xf32>
    %20 = vector.shape_cast %19 : vector<1x1x4x1xf32> to vector<4x1xf32>
    %c0_22 = arith.constant 0 : index
    %c128_23 = arith.constant 128 : index
    %21 = vector.load %arg7[%c0_22, %c128_23] : memref<4x512xbf16, #tpu.memory_space<vmem>>, vector<4x256xbf16>
    %22 = arith.extf %21 : vector<4x256xbf16> to vector<4x256xf32>
    %23 = vector.broadcast %20 : vector<4x1xf32> to vector<4x256xf32>
    %24 = arith.mulf %23, %22 : vector<4x256xf32>
    %25 = arith.addf %18, %24 : vector<4x256xf32>
    %c0_24 = arith.constant 0 : index
    %c7 = arith.constant 7 : index
    %c0_25 = arith.constant 0 : index
    %c0_26 = arith.constant 0 : index
    %26 = vector.load %arg4[%c0_24, %c7, %c0_25, %c0_26] : memref<1x9x4x1xf32, #tpu.memory_space<vmem>>, vector<1x1x4x1xf32>
    %27 = vector.shape_cast %26 : vector<1x1x4x1xf32> to vector<4x1xf32>
    %c0_27 = arith.constant 0 : index
    %c144 = arith.constant 144 : index
    %28 = vector.load %arg7[%c0_27, %c144] : memref<4x512xbf16, #tpu.memory_space<vmem>>, vector<4x256xbf16>
    %29 = arith.extf %28 : vector<4x256xbf16> to vector<4x256xf32>
    %30 = vector.broadcast %27 : vector<4x1xf32> to vector<4x256xf32>
    %31 = arith.mulf %30, %29 : vector<4x256xf32>
    %32 = arith.addf %25, %31 : vector<4x256xf32>
    %c0_28 = arith.constant 0 : index
    %c0_29 = arith.constant 0 : index
    %c0_30 = arith.constant 0 : index
    %c0_31 = arith.constant 0 : index
    %33 = vector.load %arg4[%c0_28, %c0_29, %c0_30, %c0_31] : memref<1x9x4x1xf32, #tpu.memory_space<vmem>>, vector<1x1x4x1xf32>
    %34 = vector.shape_cast %33 : vector<1x1x4x1xf32> to vector<4x1xf32>
    %c0_32 = arith.constant 0 : index
    %c111 = arith.constant 111 : index
    %35 = vector.load %arg7[%c0_32, %c111] : memref<4x512xbf16, #tpu.memory_space<vmem>>, vector<4x256xbf16>
    %36 = arith.extf %35 : vector<4x256xbf16> to vector<4x256xf32>
    %37 = vector.broadcast %34 : vector<4x1xf32> to vector<4x256xf32>
    %38 = arith.mulf %37, %36 : vector<4x256xf32>
    %c0_33 = arith.constant 0 : index
    %c3 = arith.constant 3 : index
    %c0_34 = arith.constant 0 : index
    %c0_35 = arith.constant 0 : index
    %39 = vector.load %arg4[%c0_33, %c3, %c0_34, %c0_35] : memref<1x9x4x1xf32, #tpu.memory_space<vmem>>, vector<1x1x4x1xf32>
    %40 = vector.shape_cast %39 : vector<1x1x4x1xf32> to vector<4x1xf32>
    %c0_36 = arith.constant 0 : index
    %c127 = arith.constant 127 : index
    %41 = vector.load %arg7[%c0_36, %c127] : memref<4x512xbf16, #tpu.memory_space<vmem>>, vector<4x256xbf16>
    %42 = arith.extf %41 : vector<4x256xbf16> to vector<4x256xf32>
    %43 = vector.broadcast %40 : vector<4x1xf32> to vector<4x256xf32>
    %44 = arith.mulf %43, %42 : vector<4x256xf32>
    %45 = arith.addf %38, %44 : vector<4x256xf32>
    %c0_37 = arith.constant 0 : index
    %c6 = arith.constant 6 : index
    %c0_38 = arith.constant 0 : index
    %c0_39 = arith.constant 0 : index
    %46 = vector.load %arg4[%c0_37, %c6, %c0_38, %c0_39] : memref<1x9x4x1xf32, #tpu.memory_space<vmem>>, vector<1x1x4x1xf32>
    %47 = vector.shape_cast %46 : vector<1x1x4x1xf32> to vector<4x1xf32>
    %c0_40 = arith.constant 0 : index
    %c143 = arith.constant 143 : index
    %48 = vector.load %arg7[%c0_40, %c143] : memref<4x512xbf16, #tpu.memory_space<vmem>>, vector<4x256xbf16>
    %49 = arith.extf %48 : vector<4x256xbf16> to vector<4x256xf32>
    %50 = vector.broadcast %47 : vector<4x1xf32> to vector<4x256xf32>
    %51 = arith.mulf %50, %49 : vector<4x256xf32>
    %52 = arith.addf %45, %51 : vector<4x256xf32>
    %53 = vector.broadcast %11 : vector<1x256xf32> to vector<4x256xf32>
    %54 = arith.mulf %53, %52 : vector<4x256xf32>
    %55 = arith.addf %32, %54 : vector<4x256xf32>
    %c0_41 = arith.constant 0 : index
    %c2 = arith.constant 2 : index
    %c0_42 = arith.constant 0 : index
    %c0_43 = arith.constant 0 : index
    %56 = vector.load %arg4[%c0_41, %c2, %c0_42, %c0_43] : memref<1x9x4x1xf32, #tpu.memory_space<vmem>>, vector<1x1x4x1xf32>
    %57 = vector.shape_cast %56 : vector<1x1x4x1xf32> to vector<4x1xf32>
    %c0_44 = arith.constant 0 : index
    %c113 = arith.constant 113 : index
    %58 = vector.load %arg7[%c0_44, %c113] : memref<4x512xbf16, #tpu.memory_space<vmem>>, vector<4x256xbf16>
    %59 = arith.extf %58 : vector<4x256xbf16> to vector<4x256xf32>
    %60 = vector.broadcast %57 : vector<4x1xf32> to vector<4x256xf32>
    %61 = arith.mulf %60, %59 : vector<4x256xf32>
    %c0_45 = arith.constant 0 : index
    %c5 = arith.constant 5 : index
    %c0_46 = arith.constant 0 : index
    %c0_47 = arith.constant 0 : index
    %62 = vector.load %arg4[%c0_45, %c5, %c0_46, %c0_47] : memref<1x9x4x1xf32, #tpu.memory_space<vmem>>, vector<1x1x4x1xf32>
    %63 = vector.shape_cast %62 : vector<1x1x4x1xf32> to vector<4x1xf32>
    %c0_48 = arith.constant 0 : index
    %c129 = arith.constant 129 : index
    %64 = vector.load %arg7[%c0_48, %c129] : memref<4x512xbf16, #tpu.memory_space<vmem>>, vector<4x256xbf16>
    %65 = arith.extf %64 : vector<4x256xbf16> to vector<4x256xf32>
    %66 = vector.broadcast %63 : vector<4x1xf32> to vector<4x256xf32>
    %67 = arith.mulf %66, %65 : vector<4x256xf32>
    %68 = arith.addf %61, %67 : vector<4x256xf32>
    %c0_49 = arith.constant 0 : index
    %c8 = arith.constant 8 : index
    %c0_50 = arith.constant 0 : index
    %c0_51 = arith.constant 0 : index
    %69 = vector.load %arg4[%c0_49, %c8, %c0_50, %c0_51] : memref<1x9x4x1xf32, #tpu.memory_space<vmem>>, vector<1x1x4x1xf32>
    %70 = vector.shape_cast %69 : vector<1x1x4x1xf32> to vector<4x1xf32>
    %c0_52 = arith.constant 0 : index
    %c145 = arith.constant 145 : index
    %71 = vector.load %arg7[%c0_52, %c145] : memref<4x512xbf16, #tpu.memory_space<vmem>>, vector<4x256xbf16>
    %72 = arith.extf %71 : vector<4x256xbf16> to vector<4x256xf32>
    %73 = vector.broadcast %70 : vector<4x1xf32> to vector<4x256xf32>
    %74 = arith.mulf %73, %72 : vector<4x256xf32>
    %75 = arith.addf %68, %74 : vector<4x256xf32>
    %76 = vector.broadcast %12 : vector<1x256xf32> to vector<4x256xf32>
    %77 = arith.mulf %76, %75 : vector<4x256xf32>
    %78 = arith.addf %55, %77 : vector<4x256xf32>
    %79 = arith.truncf %78 : vector<4x256xf32> to vector<4x256xbf16>
    %c0_53 = arith.constant 0 : index
    %c0_54 = arith.constant 0 : index
    %c0_55 = arith.constant 0 : index
    %c0_56 = arith.constant 0 : index
    %80 = vector.load %arg6[%c0_53, %c0_54, %c0_55, %c0_56] : memref<1x1x4x256xbf16, #tpu.memory_space<vmem>>, vector<1x1x4x256xbf16>
    %81 = vector.shape_cast %80 : vector<1x1x4x256xbf16> to vector<4x256xbf16>
    %82 = vector.shape_cast %79 : vector<4x256xbf16> to vector<1x1x4x256xbf16>
    tpu.vector_store %arg6[%c0_53, %c0_54, %c0_55, %c0_56], %82 {strides = array<i32>} : memref<1x1x4x256xbf16, #tpu.memory_space<vmem>>, vector<1x1x4x256xbf16>,
    return
  }
  func.func @transform_0(%arg0: i32, %arg1: i32) -> (i32, i32, i32) {
    %c0_i32 = arith.constant 0 : i32
    %c0_i32_0 = arith.constant 0 : i32
    %c0_i32_1 = arith.constant 0 : i32
    return %arg0, %c0_i32, %c0_i32_0 : i32, i32, i32
  }
  func.func @transform_1(%arg0: i32, %arg1: i32) -> (i32, i32, i32) {
    %c0_i32 = arith.constant 0 : i32
    %c0_i32_0 = arith.constant 0 : i32
    %c0_i32_1 = arith.constant 0 : i32
    return %arg1, %c0_i32, %c0_i32_0 : i32, i32, i32
  }
  func.func @transform_2(%arg0: i32, %arg1: i32) -> (i32, i32, i32, i32) {
    %c0_i32 = arith.constant 0 : i32
    %c0_i32_0 = arith.constant 0 : i32
    %c0_i32_1 = arith.constant 0 : i32
    %c0_i32_2 = arith.constant 0 : i32
    return %arg1, %c0_i32, %c0_i32_0, %c0_i32_1 : i32, i32, i32, i32
  }
  func.func @transform_3(%arg0: i32, %arg1: i32) -> (i32, i32) {
    %c0_i32 = arith.constant 0 : i32
    %c0_i32_0 = arith.constant 0 : i32
    %c0_i32_1 = arith.constant 0 : i32
    return %c0_i32, %c0_i32_0 : i32, i32
  }
  func.func @transform_4(%arg0: i32, %arg1: i32) -> (i32, i32, i32, i32) {
    %c0_i32 = arith.constant 0 : i32
    %c0_i32_0 = arith.constant 0 : i32
    %c0_i32_1 = arith.constant 0 : i32
    return %arg0, %arg1, %c0_i32, %c0_i32_0 : i32, i32, i32, i32
  }
}

module attributes {stable_mosaic.version = 11 : i64} {
  func.func @_attn_stats_kernel(%arg0: i32, %arg1: i32, %arg2: memref<1x4x256xbf16, #tpu.memory_space<vmem>>, %arg3: memref<1x1x4x256xbf16, #tpu.memory_space<vmem>>, %arg4: memref<1x4x4xf32, #tpu.memory_space<vmem>>, %arg5: memref<1x4x1xf32, #tpu.memory_space<vmem>>, %arg6: memref<1x4x1xf32, #tpu.memory_space<vmem>>) attributes {dimension_semantics = [#tpu.dimension_semantics<parallel>, #tpu.dimension_semantics<arbitrary>], iteration_bounds = array<i64: 2, 1>, scalar_prefetch = 0 : i64, scratch_operands = 0 : i64, tpu.core_type = #tpu.core_type<tc>, window_params = [{transform_indices = @transform_0, window_bounds = array<i64: 1, 4, 256>}, {transform_indices = @transform_1, window_bounds = array<i64: 1, 1, 4, 256>}, {transform_indices = @transform_2, window_bounds = array<i64: 1, 4, 4>}, {transform_indices = @transform_3, window_bounds = array<i64: 1, 4, 1>}, {transform_indices = @transform_4, window_bounds = array<i64: 1, 4, 1>}]} {
    %c0_i32 = arith.constant 0 : i32
    %0 = arith.cmpi eq, %arg1, %c0_i32 : i32
    %1 = arith.extui %0 : i1 to i32
    %c0_i32_0 = arith.constant 0 : i32
    %2 = arith.cmpi ne, %1, %c0_i32_0 : i32
    scf.if %2 {
      %cst_27 = arith.constant 0.000000e+00 : f32
      %34 = vector.broadcast %cst_27 : f32 to vector<1x4x4xf32>
      %c0_28 = arith.constant 0 : index
      %c0_29 = arith.constant 0 : index
      %c0_30 = arith.constant 0 : index
      %35 = vector.load %arg4[%c0_28, %c0_29, %c0_30] : memref<1x4x4xf32, #tpu.memory_space<vmem>>, vector<1x4x4xf32>
      tpu.vector_store %arg4[%c0_28, %c0_29, %c0_30], %34 {strides = array<i32>} : memref<1x4x4xf32, #tpu.memory_space<vmem>>, vector<1x4x4xf32>,
      %cst_31 = arith.constant 0.000000e+00 : f32
      %36 = vector.broadcast %cst_31 : f32 to vector<1x4x1xf32>
      %c0_32 = arith.constant 0 : index
      %c0_33 = arith.constant 0 : index
      %c0_34 = arith.constant 0 : index
      %37 = vector.load %arg5[%c0_32, %c0_33, %c0_34] : memref<1x4x1xf32, #tpu.memory_space<vmem>>, vector<1x4x1xf32>
      tpu.vector_store %arg5[%c0_32, %c0_33, %c0_34], %36 {strides = array<i32>} : memref<1x4x1xf32, #tpu.memory_space<vmem>>, vector<1x4x1xf32>,
      %cst_35 = arith.constant 0.000000e+00 : f32
      %38 = vector.broadcast %cst_35 : f32 to vector<1x4x1xf32>
      %c0_36 = arith.constant 0 : index
      %c0_37 = arith.constant 0 : index
      %c0_38 = arith.constant 0 : index
      %39 = vector.load %arg6[%c0_36, %c0_37, %c0_38] : memref<1x4x1xf32, #tpu.memory_space<vmem>>, vector<1x4x1xf32>
      tpu.vector_store %arg6[%c0_36, %c0_37, %c0_38], %38 {strides = array<i32>} : memref<1x4x1xf32, #tpu.memory_space<vmem>>, vector<1x4x1xf32>,
    } else {
    }
    %c0 = arith.constant 0 : index
    %c0_1 = arith.constant 0 : index
    %c0_2 = arith.constant 0 : index
    %3 = vector.load %arg2[%c0, %c0_1, %c0_2] : memref<1x4x256xbf16, #tpu.memory_space<vmem>>, vector<1x4x256xbf16>
    %4 = vector.shape_cast %3 : vector<1x4x256xbf16> to vector<4x256xbf16>
    %c0_3 = arith.constant 0 : index
    %c0_4 = arith.constant 0 : index
    %c0_5 = arith.constant 0 : index
    %c0_6 = arith.constant 0 : index
    %5 = vector.load %arg3[%c0_3, %c0_4, %c0_5, %c0_6] : memref<1x1x4x256xbf16, #tpu.memory_space<vmem>>, vector<1x1x4x256xbf16>
    %6 = vector.shape_cast %5 : vector<1x1x4x256xbf16> to vector<4x256xbf16>
    %c0_7 = arith.constant 0 : index
    %c0_8 = arith.constant 0 : index
    %c0_9 = arith.constant 0 : index
    %7 = vector.load %arg4[%c0_7, %c0_8, %c0_9] : memref<1x4x4xf32, #tpu.memory_space<vmem>>, vector<1x4x4xf32>
    %8 = vector.shape_cast %7 : vector<1x4x4xf32> to vector<4x4xf32>
    %cst = arith.constant dense<0.000000e+00> : vector<4x4xf32>
    %9 = tpu.matmul %4, %6, %cst {dimension_numbers = #tpu.dot_dimension_numbers<[1], [1], [0], [0], [0, 0, 1, 0], [], []>} : vector<4x256xbf16>, vector<4x256xbf16>, vector<4x4xf32> -> vector<4x4xf32>
    %10 = arith.addf %8, %9 : vector<4x4xf32>
    %c0_10 = arith.constant 0 : index
    %c0_11 = arith.constant 0 : index
    %c0_12 = arith.constant 0 : index
    %11 = vector.load %arg4[%c0_10, %c0_11, %c0_12] : memref<1x4x4xf32, #tpu.memory_space<vmem>>, vector<1x4x4xf32>
    %12 = vector.shape_cast %11 : vector<1x4x4xf32> to vector<4x4xf32>
    %13 = vector.shape_cast %10 : vector<4x4xf32> to vector<1x4x4xf32>
    tpu.vector_store %arg4[%c0_10, %c0_11, %c0_12], %13 {strides = array<i32>} : memref<1x4x4xf32, #tpu.memory_space<vmem>>, vector<1x4x4xf32>,
    %14 = arith.extf %4 : vector<4x256xbf16> to vector<4x256xf32>
    %15 = arith.extf %6 : vector<4x256xbf16> to vector<4x256xf32>
    %c0_13 = arith.constant 0 : index
    %c0_14 = arith.constant 0 : index
    %c0_15 = arith.constant 0 : index
    %16 = vector.load %arg5[%c0_13, %c0_14, %c0_15] : memref<1x4x1xf32, #tpu.memory_space<vmem>>, vector<1x4x1xf32>
    %17 = vector.shape_cast %16 : vector<1x4x1xf32> to vector<4x1xf32>
    %18 = arith.mulf %14, %14 : vector<4x256xf32>
    %cst_16 = arith.constant dense<0.000000e+00> : vector<4xf32>
    %19 = vector.multi_reduction <add>, %18, %cst_16 [1] : vector<4x256xf32> to vector<4xf32>
    %20 = vector.shape_cast %19 : vector<4xf32> to vector<4x1xf32>
    %21 = arith.addf %17, %20 : vector<4x1xf32>
    %c0_17 = arith.constant 0 : index
    %c0_18 = arith.constant 0 : index
    %c0_19 = arith.constant 0 : index
    %22 = vector.load %arg5[%c0_17, %c0_18, %c0_19] : memref<1x4x1xf32, #tpu.memory_space<vmem>>, vector<1x4x1xf32>
    %23 = vector.shape_cast %22 : vector<1x4x1xf32> to vector<4x1xf32>
    %24 = vector.shape_cast %21 : vector<4x1xf32> to vector<1x4x1xf32>
    tpu.vector_store %arg5[%c0_17, %c0_18, %c0_19], %24 {strides = array<i32>} : memref<1x4x1xf32, #tpu.memory_space<vmem>>, vector<1x4x1xf32>,
    %c0_20 = arith.constant 0 : index
    %c0_21 = arith.constant 0 : index
    %c0_22 = arith.constant 0 : index
    %25 = vector.load %arg6[%c0_20, %c0_21, %c0_22] : memref<1x4x1xf32, #tpu.memory_space<vmem>>, vector<1x4x1xf32>
    %26 = vector.shape_cast %25 : vector<1x4x1xf32> to vector<4x1xf32>
    %27 = arith.mulf %15, %15 : vector<4x256xf32>
    %cst_23 = arith.constant dense<0.000000e+00> : vector<4xf32>
    %28 = vector.multi_reduction <add>, %27, %cst_23 [1] : vector<4x256xf32> to vector<4xf32>
    %29 = vector.shape_cast %28 : vector<4xf32> to vector<4x1xf32>
    %30 = arith.addf %26, %29 : vector<4x1xf32>
    %c0_24 = arith.constant 0 : index
    %c0_25 = arith.constant 0 : index
    %c0_26 = arith.constant 0 : index
    %31 = vector.load %arg6[%c0_24, %c0_25, %c0_26] : memref<1x4x1xf32, #tpu.memory_space<vmem>>, vector<1x4x1xf32>
    %32 = vector.shape_cast %31 : vector<1x4x1xf32> to vector<4x1xf32>
    %33 = vector.shape_cast %30 : vector<4x1xf32> to vector<1x4x1xf32>
    tpu.vector_store %arg6[%c0_24, %c0_25, %c0_26], %33 {strides = array<i32>} : memref<1x4x1xf32, #tpu.memory_space<vmem>>, vector<1x4x1xf32>,
    return
  }
  func.func @transform_0(%arg0: i32, %arg1: i32) -> (i32, i32, i32) {
    %c0_i32 = arith.constant 0 : i32
    %c0_i32_0 = arith.constant 0 : i32
    return %arg0, %c0_i32, %arg1 : i32, i32, i32
  }
  func.func @transform_1(%arg0: i32, %arg1: i32) -> (i32, i32, i32, i32) {
    %c0_i32 = arith.constant 0 : i32
    %c0_i32_0 = arith.constant 0 : i32
    %c0_i32_1 = arith.constant 0 : i32
    return %arg0, %c0_i32, %c0_i32_0, %arg1 : i32, i32, i32, i32
  }
  func.func @transform_2(%arg0: i32, %arg1: i32) -> (i32, i32, i32) {
    %c0_i32 = arith.constant 0 : i32
    %c0_i32_0 = arith.constant 0 : i32
    %c0_i32_1 = arith.constant 0 : i32
    return %arg0, %c0_i32, %c0_i32_0 : i32, i32, i32
  }
  func.func @transform_3(%arg0: i32, %arg1: i32) -> (i32, i32, i32) {
    %c0_i32 = arith.constant 0 : i32
    %c0_i32_0 = arith.constant 0 : i32
    %c0_i32_1 = arith.constant 0 : i32
    return %arg0, %c0_i32, %c0_i32_0 : i32, i32, i32
  }
  func.func @transform_4(%arg0: i32, %arg1: i32) -> (i32, i32, i32) {
    %c0_i32 = arith.constant 0 : i32
    %c0_i32_0 = arith.constant 0 : i32
    %c0_i32_1 = arith.constant 0 : i32
    return %arg0, %c0_i32, %c0_i32_0 : i32, i32, i32
  }
}

module attributes {stable_mosaic.version = 11 : i64} {
  func.func @_attn_apply_kernel(%arg0: i32, %arg1: i32, %arg2: memref<1x4x4xf32, #tpu.memory_space<vmem>>, %arg3: memref<1x4x1xf32, #tpu.memory_space<vmem>>, %arg4: memref<1x1x4xf32, #tpu.memory_space<vmem>>, %arg5: memref<4x4xf32, #tpu.memory_space<vmem>>, %arg6: memref<4x4xf32, #tpu.memory_space<vmem>>, %arg7: memref<1x1x4x256xbf16, #tpu.memory_space<vmem>>, %arg8: memref<1x4x256xf32, #tpu.memory_space<vmem>>) attributes {dimension_semantics = [#tpu.dimension_semantics<parallel>, #tpu.dimension_semantics<parallel>], iteration_bounds = array<i64: 2, 1>, scalar_prefetch = 0 : i64, scratch_operands = 0 : i64, tpu.core_type = #tpu.core_type<tc>, window_params = [{transform_indices = @transform_0, window_bounds = array<i64: 1, 4, 4>}, {transform_indices = @transform_1, window_bounds = array<i64: 1, 4, 1>}, {transform_indices = @transform_2, window_bounds = array<i64: 1, 1, 4>}, {pipeline_mode = #tpu.pipeline_mode<synchronous>, transform_indices = @transform_3, window_bounds = array<i64: 4, 4>}, {pipeline_mode = #tpu.pipeline_mode<synchronous>, transform_indices = @transform_4, window_bounds = array<i64: 4, 4>}, {transform_indices = @transform_5, window_bounds = array<i64: 1, 1, 4, 256>}, {transform_indices = @transform_6, window_bounds = array<i64: 1, 4, 256>}]} {
    %c0 = arith.constant 0 : index
    %c0_0 = arith.constant 0 : index
    %c0_1 = arith.constant 0 : index
    %0 = vector.load %arg2[%c0, %c0_0, %c0_1] : memref<1x4x4xf32, #tpu.memory_space<vmem>>, vector<1x4x4xf32>
    %1 = vector.shape_cast %0 : vector<1x4x4xf32> to vector<4x4xf32>
    %c0_2 = arith.constant 0 : index
    %c0_3 = arith.constant 0 : index
    %c0_4 = arith.constant 0 : index
    %2 = vector.load %arg3[%c0_2, %c0_3, %c0_4] : memref<1x4x1xf32, #tpu.memory_space<vmem>>, vector<1x4x1xf32>
    %3 = vector.shape_cast %2 : vector<1x4x1xf32> to vector<4x1xf32>
    %4 = vector.broadcast %3 : vector<4x1xf32> to vector<4x4xf32>
    %5 = arith.mulf %1, %4 : vector<4x4xf32>
    %c0_5 = arith.constant 0 : index
    %c0_6 = arith.constant 0 : index
    %c0_7 = arith.constant 0 : index
    %6 = vector.load %arg4[%c0_5, %c0_6, %c0_7] : memref<1x1x4xf32, #tpu.memory_space<vmem>>, vector<1x1x4xf32>
    %7 = vector.shape_cast %6 : vector<1x1x4xf32> to vector<1x4xf32>
    %8 = vector.broadcast %7 : vector<1x4xf32> to vector<4x4xf32>
    %9 = arith.mulf %5, %8 : vector<4x4xf32>
    %c0_8 = arith.constant 0 : index
    %c0_9 = arith.constant 0 : index
    %10 = vector.load %arg5[%c0_8, %c0_9] : memref<4x4xf32, #tpu.memory_space<vmem>>, vector<4x4xf32>
    %11 = arith.addf %9, %10 : vector<4x4xf32>
    %cst = arith.constant dense<0xFF800000> : vector<4xf32>
    %12 = vector.multi_reduction <maximumf>, %11, %cst [1] : vector<4x4xf32> to vector<4xf32>
    %13 = vector.shape_cast %12 : vector<4xf32> to vector<4x1xf32>
    %14 = vector.broadcast %13 : vector<4x1xf32> to vector<4x4xf32>
    %15 = arith.subf %11, %14 : vector<4x4xf32>
    %16 = math.exp %15 : vector<4x4xf32>
    %cst_10 = arith.constant dense<0.000000e+00> : vector<4xf32>
    %17 = vector.multi_reduction <add>, %16, %cst_10 [1] : vector<4x4xf32> to vector<4xf32>
    %18 = vector.shape_cast %17 : vector<4xf32> to vector<4x1xf32>
    %19 = vector.broadcast %18 : vector<4x1xf32> to vector<4x4xf32>
    %20 = arith.divf %16, %19 : vector<4x4xf32>
    %c0_11 = arith.constant 0 : index
    %c0_12 = arith.constant 0 : index
    %21 = vector.load %arg6[%c0_11, %c0_12] : memref<4x4xf32, #tpu.memory_space<vmem>>, vector<4x4xf32>
    %cst_13 = arith.constant dense<0.000000e+00> : vector<4x4xf32>
    %22 = tpu.matmul %21, %20, %cst_13 {dimension_numbers = #tpu.dot_dimension_numbers<[1], [0], [0], [1], [0, 0, 1, 1], [], []>} : vector<4x4xf32>, vector<4x4xf32>, vector<4x4xf32> -> vector<4x4xf32>
    %23 = arith.truncf %22 : vector<4x4xf32> to vector<4x4xbf16>
    %c0_14 = arith.constant 0 : index
    %c0_15 = arith.constant 0 : index
    %c0_16 = arith.constant 0 : index
    %c0_17 = arith.constant 0 : index
    %24 = vector.load %arg7[%c0_14, %c0_15, %c0_16, %c0_17] : memref<1x1x4x256xbf16, #tpu.memory_space<vmem>>, vector<1x1x4x256xbf16>
    %25 = vector.shape_cast %24 : vector<1x1x4x256xbf16> to vector<4x256xbf16>
    %cst_18 = arith.constant dense<0.000000e+00> : vector<4x256xf32>
    %26 = tpu.matmul %23, %25, %cst_18 {dimension_numbers = #tpu.dot_dimension_numbers<[1], [0], [0], [1], [0, 0, 1, 1], [], []>} : vector<4x4xbf16>, vector<4x256xbf16>, vector<4x256xf32> -> vector<4x256xf32>
    %c0_19 = arith.constant 0 : index
    %c0_20 = arith.constant 0 : index
    %c0_21 = arith.constant 0 : index
    %27 = vector.load %arg8[%c0_19, %c0_20, %c0_21] : memref<1x4x256xf32, #tpu.memory_space<vmem>>, vector<1x4x256xf32>
    %28 = vector.shape_cast %27 : vector<1x4x256xf32> to vector<4x256xf32>
    %29 = vector.shape_cast %26 : vector<4x256xf32> to vector<1x4x256xf32>
    tpu.vector_store %arg8[%c0_19, %c0_20, %c0_21], %29 {strides = array<i32>} : memref<1x4x256xf32, #tpu.memory_space<vmem>>, vector<1x4x256xf32>,
    return
  }
  func.func @transform_0(%arg0: i32, %arg1: i32) -> (i32, i32, i32) {
    %c0_i32 = arith.constant 0 : i32
    %c0_i32_0 = arith.constant 0 : i32
    %c0_i32_1 = arith.constant 0 : i32
    return %arg0, %c0_i32, %c0_i32_0 : i32, i32, i32
  }
  func.func @transform_1(%arg0: i32, %arg1: i32) -> (i32, i32, i32) {
    %c0_i32 = arith.constant 0 : i32
    %c0_i32_0 = arith.constant 0 : i32
    %c0_i32_1 = arith.constant 0 : i32
    return %arg0, %c0_i32, %c0_i32_0 : i32, i32, i32
  }
  func.func @transform_2(%arg0: i32, %arg1: i32) -> (i32, i32, i32) {
    %c0_i32 = arith.constant 0 : i32
    %c0_i32_0 = arith.constant 0 : i32
    %c0_i32_1 = arith.constant 0 : i32
    return %arg0, %c0_i32, %c0_i32_0 : i32, i32, i32
  }
  func.func @transform_3(%arg0: i32, %arg1: i32) -> (i32, i32) {
    %c0_i32 = arith.constant 0 : i32
    %c0_i32_0 = arith.constant 0 : i32
    %c0_i32_1 = arith.constant 0 : i32
    return %c0_i32, %c0_i32_0 : i32, i32
  }
  func.func @transform_4(%arg0: i32, %arg1: i32) -> (i32, i32) {
    %c0_i32 = arith.constant 0 : i32
    %c0_i32_0 = arith.constant 0 : i32
    %c0_i32_1 = arith.constant 0 : i32
    return %c0_i32, %c0_i32_0 : i32, i32
  }
  func.func @transform_5(%arg0: i32, %arg1: i32) -> (i32, i32, i32, i32) {
    %c1_i32 = arith.constant 1 : i32
    %c0_i32 = arith.constant 0 : i32
    %c0_i32_0 = arith.constant 0 : i32
    return %arg0, %c1_i32, %c0_i32, %arg1 : i32, i32, i32, i32
  }
  func.func @transform_6(%arg0: i32, %arg1: i32) -> (i32, i32, i32) {
    %c0_i32 = arith.constant 0 : i32
    %c0_i32_0 = arith.constant 0 : i32
    return %arg0, %c0_i32, %arg1 : i32, i32, i32
  }
}

</mosaic_0001>

<bundles_post_ra>
// kernel: mdta_forward.6
= control target key start
LH: loop header
LB: loop body
LE: loop exit
PB: predicated region body
PF: predicated region fallthrough
CT: control target
= control target key end

     0   :  { %s627_s15 = smov 0   ;;  %s629_s16 = smov 0   ;;  %s686_s0 = inlined_call_operand.vmem [shape: bf16[2,4,256], index: 0, kind: input, shape index: {}]   ;;  %s687_s1 = inlined_call_operand.vmem [shape: bf16[2,2,4,256], index: 1, kind: input, shape index: {}]   ;;  %s688_s2 = inlined_call_operand.vmem [shape: f32[2,4,4], index: 2, kind: output, shape index: {0}]   ;;  %s689_s3 = inlined_call_operand.vmem [shape: f32[2,4,1], index: 3, kind: output, shape index: {1}]   ;;  %s690_s4 = inlined_call_operand.vmem [shape: f32[2,4,1], index: 4, kind: output, shape index: {2}]  }
   0x1   :  { %s631_s17 = smov 0  }
   0x2 LB: > { %s27_s18 = sadd.s32 1, %s594_s16  ;;  %p538_p0 = scmp.ge.s32.totalorder %s598_s17, 1  ;;  %s598_s17 = sphi %s631_s17, %s15_s17   ;;  %s594_s16 = sphi %s629_s16, %s692_s16   ;;  %s590_s15 = sphi %s627_s15, %s691_s15  }
   0x3   : > { %p29_p1 = scmp.ge.s32.totalorder %s27_s18, 2  ;;  %p203_p2 = scmp.lt.s32.totalorder %s598_s17, 3 }
   0x5   : > { %s694_s18 = smov (%p29_p1, %s27_s18), 0  ;;  %p204_p3 = pnand %p538_p0, %p203_p2 }
   0x6   : > { %p250_p4 = scmp.lt.s32.totalorder (!%p204_p3), %s590_s15, 1 }
   0x7   : > { %207 = sbr.rel (%p204_p3) target bundleno = 230 (0xe6), region = 28 }
   0xc   : > { %v298_v0 = vlaneseq  ;;  %v600_v1 = vmov 1983009808   ;;  %s696_s15 = smov (!%p250_p4, %s590_s15), 1  ;;  %vm288_vm0 = vcmask 3072   ;;  %v601_v12 = vmov 0.0  }
   0xd   : > { %v296_v2 = vunpack.c.l.s4 %v600_v1  ;;  %s549_s19 = sshll.u32 %s696_s15, 3  ;;  %s645_s20 = sshll.u32 %s696_s15, 2  ;;  %vm366_vm1 = vcmask 1043456   ;;  %vm286_vm2 = vcmask 27648  }
   0xe   : > { %v299_v3 = vshrl.u32 %v298_v0, 7  ;;  %s267_s23 = scalar_lea.vmem %s687_s1, %s549_s19  ;;  %s257_s26 = scalar_lea.vmem %s686_s0, %s645_s20 }
   0xf   : > { %v297_v4 = vunpack.c.0.s8 %v296_v2  ;;  %v292_v6 = vld [vmem:[%s267_s23] sm:$0xf]  ;;  %s658_s29 = scalar_lea.vmem %s689_s3, %s645_s20  ;;  %s272_s6 = scalar_lea.vmem %s688_s2, %s645_s20 }
  0x10   : > { %v291_v7 = vld [vmem:[%s257_s26] sm:$0xf]  ;;  %v360_v9 = vunpack.c.l.bf16 %v292_v6  ;;  %289 = vst.msk [vmem:[%s658_s29] sm:$0xf] %vm288_vm0, %v601_v12  ;;  %s280_s9 = scalar_lea.vmem %s690_s4, %s645_s20 }
  0x11   : > { %v300_v5 = vsub.s32 %v297_v4, %v299_v3  ;;  %v359_v11 = vunpack.c.l.bf16 %v291_v7  ;;  %287 = vst.msk [vmem:[%s272_s6] sm:$0xf] %vm286_vm2, %v601_v12 }
  0x12   : > { %v376_v16 = vmul.f32 %v360_v9, %v360_v9  ;;  %290 = vst.msk [vmem:[%s280_s9] sm:$0xf] %vm288_vm0, %v601_v12 }
  0x13   : > { %v312_v8 = vrot.slane %v292_v6, %v300_v5  ;;  %v301_v10 = vrot.slane %v291_v7, %v300_v5  ;;  %v362_v15 = vmul.f32 %v359_v11, %v359_v11 }
  0x14   : > { %v378_v19 = vcombine.high %v376_v16, %v376_v16  ;;  %v380_v21 = vsel %vm366_vm1, %v376_v16, 0.0 }
  0x15   : > { %v313_v13 = vcombine.high %v312_v8, %v312_v8  ;;  %v302_v14 = vcombine.high %v301_v10, %v301_v10  ;;  %v364_v17 = vcombine.high %v362_v15, %v362_v15  ;;  %v367_v18 = vsel %vm366_vm1, %v362_v15, 0.0 }
  0x16   : > { %v381_v22 = vsel %vm366_vm1, %v378_v19, 0.0 }
  0x17   : > { %330 = vmatprep.subr.bf16.mxu0 %v313_v13  ;;  %348 = vmatprep.mubr.bf16.mxu0 %v302_v14  ;;  %v368_v20 = vsel %vm366_vm1, %v364_v17, 0.0  ;;  %v382_v24 = vadd.f32 %v381_v22, %v380_v21  ;;  %v361_v25 = vld [vmem:[%s658_s29] sm:$0xf] }
  0x18   : > { %331 = vmatpush1.bf16.xpose.msra.mxu0 %v312_v8  ;;  %v369_v23 = vadd.f32 %v368_v20, %v367_v18  ;;  %v293_v31 = vld [vmem:[%s272_s6] sm:$0xf] }
  0x19   : > { %v375_v28 = vld [vmem:[%s280_s9] sm:$0xf] }
  0x1a   : > { %370 = vadd.xlane.f32.xlu0 %v369_v23 }
  0x1e   : > { %383 = vadd.xlane.f32.xlu0 %v382_v24 }
  0x1f   : > { %349 = vmatmul.mubr.bf16.vlgmr.msra.gmra.mxu0 %v301_v10 }
  0xa3   : > { %v371_v26 = vpop.xlane.xlu0 %370 }
  0xa4   : > { %v372_v27 = vadd.f32 %v371_v26, %v361_v25 }
  0xa6   : > { %374 = vst.msk [vmem:[%s658_s29] sm:$0xf] %vm288_vm0, %v372_v27 }
  0xa7   : > { %v384_v29 = vpop.xlane.xlu0 %383 }
  0xa8   : > { %v385_v30 = vadd.f32 %v384_v29, %v375_v28 }
  0xaa   : > { %386 = vst.msk [vmem:[%s280_s9] sm:$0xf] %vm288_vm0, %v385_v30 }
  0xdf   : > { %v350_v32 = vpop.f32.mrf.mxu0 }
  0xe0   : > { %v356_v33 = vadd.f32 %v350_v32, %v293_v31 }
  0xe1   : > { %v352_v34 = vpop.f32.mrf.mxu0 }
  0xe2   : > { %358 = vst.msk [vmem:[%s272_s6] sm:$0xf] %vm286_vm2, %v356_v33 }
  0xe3   : > { %v353_v35 = vpop.f32.mrf.mxu0 }
  0xe5   : > { %v354_v36 = vpop.f32.mrf.mxu0 }
  0xe6 PF: > { %s15_s17 = sadd.s32 1, %s598_s17   ;;  %s691_s15 = smov %s594_s16 }
  0xe7   : > { %p12_p5 = scmp.ge.s32.totalorder %s15_s17, 4   ;;  %s692_s16 = smov %s694_s18 }
  0xe9   :  { %14 = sbr.rel (!%p12_p5) target bundleno = 2 (0x2), region = 89 }

// kernel: mdta_forward.4
= control target key start
LH: loop header
LB: loop body
LE: loop exit
PB: predicated region body
PF: predicated region fallthrough
CT: control target
= control target key end

     0   :  { %s924_s15 = smov 0   ;;  %s926_s16 = smov 0   ;;  %s1039_s0 = inlined_call_operand.vmem [shape: bf16[2,4,256], index: 0, kind: input, shape index: {}]   ;;  %s1040_s1 = inlined_call_operand.vmem [shape: bf16[2,4,4], index: 1, kind: input, shape index: {}]   ;;  %s1041_s2 = inlined_call_operand.vmem [shape: f32[2,9,4,1], index: 2, kind: input, shape index: {}]   ;;  %s1042_s3 = inlined_call_operand.vmem [shape: f32[2,256], index: 3, kind: input, shape index: {}]   ;;  %s1043_s4 = inlined_call_operand.vmem [shape: bf16[2,2,4,256], index: 4, kind: output, shape index: {}]  }
   0x1   :  { %s928_s17 = smov 0   ;;  %s930_s18 = smov 0  }
   0x2   :  { %s932_s19 = smov 0  }
   0x3 LB: > { %s23_s20 = sadd.s32 1, %s880_s17  ;;  %s26_s21 = sadd.s32 1, %s884_s18  ;;  %s888_s19 = sphi %s932_s19, %s14_s19   ;;  %s884_s18 = sphi %s930_s18, %s1047_s18   ;;  %s880_s17 = sphi %s928_s17, %s1046_s17   ;;  %s876_s16 = sphi %s926_s16, %s1045_s16   ;;  %s872_s15 = sphi %s924_s15, %s1044_s15  }
   0x4   : > { %p24_p0 = scmp.ge.s32.totalorder %s23_s20, 2  ;;  %p731_p1 = scmp.ge.s32.totalorder %s888_s19, 1 }
   0x5   : > { %p195_p2 = scmp.lt.s32.totalorder %s888_s19, 5 }
   0x6   : > { %s1049_s20 = smov (%p24_p0, %s23_s20), 0  ;;  %s1051_s21 = smov (!%p24_p0, %s26_s21), %s884_s18 }
   0x7   : > { %p196_p3 = pnand %p731_p1, %p195_p2  ;;  %p28_p4 = scmp.ge.s32.totalorder %s1051_s21, 2 }
   0x8   : > { %p234_p5 = scmp.lt.s32.totalorder (!%p196_p3), %s876_s16, 1  ;;  %p239_p6 = scmp.lt.s32.totalorder (!%p196_p3), %s872_s15, 1 }
   0x9   : > { %s1053_s21 = smov (%p28_p4, %s1051_s21), 0  ;;  %199 = sbr.rel (%p196_p3) target bundleno = 390 (0x186), region = 36 }
   0xa   : > { %s891_s9 = smov (!%p196_p3), 17   ;;  %s892_s10 = smov (!%p196_p3), 1  }
   0xb   : > { %s893_s11 = smov (!%p196_p3), 16   ;;  %s894_s12 = smov (!%p196_p3), 113  }
   0xc   : > { %s895_s13 = smov (!%p196_p3), 15   ;;  %s896_s14 = smov (!%p196_p3), 127  }
   0xe   : > { %v890_v0 = vmov 0   ;;  %s1055_s16 = smov (!%p234_p5, %s876_s16), 1  ;;  %s1057_s15 = smov (!%p239_p6, %s872_s15), 1  ;;  %vm273_vm0 = vcmask 1041408   ;;  %vm269_vm1 = vcmask 31744   ;;  %vm454_vm2 = vcmask 7168  }
   0xf   : > { %312 = vmatprep.mubr.bf16.mxu0 %v890_v0  ;;  %321 = vst [vmem:[#allocation2] sm:$0x3] %v890_v0  ;;  %322 = vst [vmem:[#allocation2 + $0x6] sm:$0x3] %v890_v0  ;;  %808 = vset.pattern.permute.xlu0 %v890_v0  ;;  %s757_s22 = sshll.u32 %s1055_s16, 2  ;;  %s734_s26 = sshll.u32 %s1057_s15, 1 }
  0x10   : > { %809 = vset.pattern.permute.xlu1 %v890_v0  ;;  %s238_s25 = scalar_lea.vmem %s1039_s0, %s757_s22  ;;  %s758_s27 = smul.u32 36, %s1057_s15  ;;  %vm428_vm3 = vcmask 138240   ;;  %vm482_vm4 = vcmask 924672   ;;  %vm525_vm5 = vcmask 121856   ;;  %vm551_vm6 = vcmask 1039360  }
  0x11   : > { %s957_s28 = sadd.s32 %s757_s22, %s734_s26  ;;  %v739_v1 = vld.sshfl [vmem:[%s238_s25] sm:$0x33 pattern:$0x76325410]  ;;  %s242_s5 = scalar_lea.vmem %s1040_s1, %s734_s26  ;;  %vm401_vm7 = vcmask 916480   ;;  %vm359_vm8 = vcmask 130048  }
  0x12   : > { %v268_v2 = vcombine.high %v739_v1, %v739_v1  ;;  %v275_v3 = vsel %vm273_vm0, %v739_v1, 0  ;;  %s247_s8 = scalar_lea.vmem %s1041_s2, %s758_s27  ;;  %v258_v6 = vld [vmem:[%s242_s5] sm:$0x3]  ;;  %s897_s15 = smov 112   ;;  %vm579_vm9 = vcmask 908288  }
  0x13   : > { %v745_v4 = vld [vmem:[%s247_s8 + $0x4] sm:$0xf]  ;;  %v410_v5 = vld [vmem:[%s247_s8] sm:$0xf]  ;;  %v746_v7 = vld [vmem:[%s247_s8 + $0x10] sm:$0xf] }
  0x14   : > { %740 = vmatprep.subr.msk.bf16.mxu0 %vm273_vm0, %v268_v2  ;;  %347 = vperm.xlu0 %808, %v745_v4   ;;  %v748_v8 = vld [vmem:[%s247_s8 + $0xc] sm:$0xf]  ;;  %v750_v9 = vld [vmem:[%s247_s8 + $0x8] sm:$0xf]  ;;  %v749_v10 = vld [vmem:[%s247_s8 + $0x18] sm:$0xf] }
  0x15   : > { %295 = vmatpush1.bf16.msra.mxu0 %v275_v3  ;;  %416 = vperm.xlu1 %809, %v410_v5   ;;  %v747_v11 = vld [vmem:[%s247_s8 + $0x1c] sm:$0xf]  ;;  %v751_v12 = vld [vmem:[%s247_s8 + $0x14] sm:$0xf]  ;;  %v752_v13 = vld [vmem:[%s247_s8 + $0x20] sm:$0xf] }
  0x16   : > { %s898_s16 = smov 111   ;;  %s738_s26 = sshll.u32 %s957_s28, 1 }
  0x17   : > { %s256_s30 = scalar_lea.vmem %s1043_s4, %s738_s26 }
  0x18   : > { %741 = vmatmul.mubr.msk.bf16.vlgmr.msra.gmra.mxu0 %vm269_vm1, %v258_v6  ;;  %372 = vperm.xlu0 %808, %v746_v7  }
  0x19   : > { %442 = vperm.xlu1 %809, %v748_v8  }
  0x1c   : > { %513 = vperm.xlu0 %808, %v750_v9  }
  0x1d   : > { %470 = vperm.xlu1 %809, %v749_v10   ;;  %v492_v10 = vlaneseq }
  0x20   : > { %389 = vperm.xlu0 %808, %v747_v11  }
  0x21   : > { %539 = vperm.xlu1 %809, %v751_v12  }
  0x25   : > { %567 = vperm.xlu1 %809, %v752_v13  }
  0x8f   : > { %v967_v60 = vpop.permute.xlu0 %347 }
  0x90   : > { %v417_v59 = vpop.permute.xlu1 %416 }
  0x93   : > { %v373_v62 = vpop.permute.xlu0 %372 }
  0x94   : > { %v443_v61 = vpop.permute.xlu1 %442 }
  0x97   : > { %v971_v0 = vpop.permute.xlu0 %513 }
  0x98   : > { %v969_v63 = vpop.permute.xlu1 %470 }
  0x9b   : > { %v975_v2 = vpop.permute.xlu0 %389 }
  0x9c   : > { %v973_v1 = vpop.permute.xlu1 %539 }
  0xa0   : > { %v977_v3 = vpop.permute.xlu1 %567 }
  0xd8   : > { %v314_v14 = vpop.f32.mrf.mxu0 }
  0xda   : > { %v316_v15 = vpop.f32.mrf.mxu0 }
  0xdb   : > { %v742_v16 = vpack.c.bf16 %v316_v15, %v314_v14  ;;  %v493_v14 = vshrl.u32 %v492_v10, 7 }
  0xdc   : > { %v318_v17 = vpop.f32.mrf.mxu0 }
  0xdd   : > { %743 = vst.sshfl [vmem:[#allocation2 + $0x2] sm:$0x33 pattern:$0x76325410] %v742_v16 }
  0xde   : > { %v319_v18 = vpop.f32.mrf.mxu0 }
  0xe4   : > { %v411_v19 = vld [vmem:[#allocation2] sm:$0x3f] }
  0xe5   : > { %v437_v20 = vld [vmem:[#allocation2] sm:$0x3f]  ;;  %v413_v21 = vunpack.c.h.bf16 %v411_v19  ;;  %v412_v22 = vunpack.c.l.bf16 %v411_v19 }
  0xe6   : > { %v438_v23 = vunpack.c.l.bf16 %v437_v20  ;;  %v465_v24 = vld [vmem:[#allocation2 + $0x2] sm:$0x3f]  ;;  %v439_v26 = vunpack.c.h.bf16 %v437_v20 }
  0xe7   : > { %426 = vrot.lane.b32.xlu0 %v413_v21, %s891_s9  ;;  %v421_v25 = vcombine.high %v412_v22, %v412_v22  ;;  %v466_v29 = vunpack.c.l.bf16 %v465_v24  ;;  %v342_v30 = vld [vmem:[#allocation2] sm:$0x3f]  ;;  %v467_v38 = vunpack.c.h.bf16 %v465_v24  ;;  %v494_v24 = vsub.s32 0, %v493_v14 }
  0xe8   : > { %v447_v28 = vcombine.high %v438_v23, %v438_v23  ;;  %v508_v31 = vld [vmem:[#allocation2] sm:$0x3f]  ;;  %v344_v33 = vunpack.c.h.bf16 %v342_v30  ;;  %v343_v51 = vunpack.c.l.bf16 %v342_v30 }
  0xe9   : > { %v815_v27 = vpack.i.bf16 %v421_v25, %v412_v22  ;;  %v475_v34 = vcombine.high %v466_v29, %v466_v29  ;;  %v509_v35 = vunpack.c.l.bf16 %v508_v31  ;;  %v534_v36 = vld [vmem:[#allocation2 + $0x2] sm:$0x3f]  ;;  %v510_v43 = vunpack.c.h.bf16 %v508_v31 }
  0xea   : > { %v820_v32 = vpack.i.bf16 %v447_v28, %v438_v23  ;;  %v535_v40 = vunpack.c.l.bf16 %v534_v36  ;;  %v384_v41 = vld [vmem:[#allocation2 + $0x2] sm:$0x3f]  ;;  %v536_v47 = vunpack.c.h.bf16 %v534_v36  ;;  %v352_v55 = vcombine.high %v343_v51, %v343_v51 }
  0xeb   : > { %452 = vrot.lane.b32.xlu0 %v439_v26, %s892_s10  ;;  %816 = vrot.lane.b32.xlu1 %v815_v27, %s891_s9  ;;  %v825_v37 = vpack.i.bf16 %v475_v34, %v466_v29  ;;  %v518_v39 = vcombine.high %v509_v35, %v509_v35  ;;  %v385_v45 = vunpack.c.l.bf16 %v384_v41  ;;  %v562_v46 = vld [vmem:[#allocation2 + $0x2] sm:$0x3f]  ;;  %v386_v53 = vunpack.c.h.bf16 %v384_v41 }
  0xec   : > { %v544_v44 = vcombine.high %v535_v40, %v535_v40  ;;  %v563_v50 = vunpack.c.l.bf16 %v562_v46  ;;  %v810_v57 = vpack.i.bf16 %v352_v55, %v343_v51  ;;  %v564_v58 = vunpack.c.h.bf16 %v562_v46  ;;  %v368_v9 = vld [vmem:[#allocation2 + $0x2] sm:$0xf] }
  0xed   : > { %v830_v42 = vpack.i.bf16 %v518_v39, %v509_v35  ;;  %v394_v49 = vcombine.high %v385_v45, %v385_v45  ;;  %v369_v11 = vunpack.c.l.bf16 %v368_v9  ;;  %v498_v25 = vsub.s32 1, %v493_v14  ;;  %v337_v28 = vld [vmem:[%s1042_s3] ss:$2 sm:$0x3] }
  0xee   : > { %v835_v48 = vpack.i.bf16 %v544_v44, %v535_v40  ;;  %v572_v54 = vcombine.high %v563_v50, %v563_v50  ;;  %v495_v39 = vrot.slane %v337_v28, %v494_v24 }
  0xef   : > { %821 = vrot.lane.b32.xlu1 %v820_v32, %s892_s10  ;;  %357 = vrot.lane.b32.xlu0 %v344_v33, %s893_s11  ;;  %v840_v52 = vpack.i.bf16 %v394_v49, %v385_v45  ;;  %v376_v17 = vcombine.high %v369_v11, %v369_v11  ;;  %v981_v26 = vmul.f32 %v373_v62, %v369_v11  ;;  %v744_v49 = vld [vmem:[%s1042_s3 + $0x1] ss:$2 sm:$0x3] }
  0xf0   : > { %v845_v56 = vpack.i.bf16 %v572_v54, %v563_v50  ;;  %v499_v40 = vrot.slane %v337_v28, %v498_v25 }
  0xf1   : > { %v986_v29 = vmul.f32 %v376_v17, %v373_v62  ;;  %v596_v62 = vrot.slane %v744_v49, %v498_v25 }
  0xf3   : > { %826 = vrot.lane.b32.xlu1 %v825_v37, %s894_s12  ;;  %480 = vrot.lane.b32.xlu0 %v467_v38, %s894_s12 }
  0xf7   : > { %831 = vrot.lane.b32.xlu1 %v830_v42, %s895_s13  ;;  %523 = vrot.lane.b32.xlu0 %v510_v43, %s895_s13 }
  0xfb   : > { %836 = vrot.lane.b32.xlu1 %v835_v48, %s896_s14  ;;  %549 = vrot.lane.b32.xlu0 %v536_v47, %s896_s14 }
  0xff   : > { %841 = vrot.lane.b32.xlu1 %v840_v52, %s897_s15  ;;  %399 = vrot.lane.b32.xlu0 %v386_v53, %s897_s15 }
 0x103   : > { %846 = vrot.lane.b32.xlu1 %v845_v56, %s898_s16  ;;  %811 = vrot.lane.b32.xlu0 %v810_v57, %s893_s11 }
 0x107   : > { %577 = vrot.lane.b32.xlu0 %v564_v58, %s898_s16 }
 0x159   : > { %v427_v4 = vpop.permute.xlu0 %426 }
 0x15d   : > { %v453_v5 = vpop.permute.xlu0 %452  ;;  %v817_v6 = vpop.permute.xlu1 %816 }
 0x15e   : > { %v819_v20 = vunpack.i.h.bf16 %v817_v6  ;;  %v818_v21 = vunpack.i.l.bf16 %v817_v6 }
 0x160   : > { %v429_v33 = vsel %vm428_vm3, %v818_v21, %v819_v20  ;;  %v430_v37 = vsel %vm428_vm3, %v819_v20, %v427_v4 }
 0x161   : > { %v822_v7 = vpop.permute.xlu1 %821  ;;  %v979_v8 = vpop.permute.xlu0 %357  ;;  %v433_v45 = vmul.f32 %v429_v33, %v417_v59  ;;  %v434_v50 = vmul.f32 %v430_v37, %v417_v59 }
 0x162   : > { %v824_v15 = vunpack.i.h.bf16 %v822_v7  ;;  %v823_v16 = vunpack.i.l.bf16 %v822_v7 }
 0x164   : > { %v455_v27 = vsel %vm454_vm2, %v823_v16, %v824_v15  ;;  %v456_v30 = vsel %vm454_vm2, %v824_v15, %v453_v5 }
 0x165   : > { %v827_v12 = vpop.permute.xlu1 %826  ;;  %v481_v13 = vpop.permute.xlu0 %480  ;;  %v459_v38 = vmul.f32 %v455_v27, %v443_v61  ;;  %v460_v41 = vmul.f32 %v456_v30, %v443_v61  ;;  %v592_v61 = vrot.slane %v744_v49, %v494_v24 }
 0x166   : > { %v829_v22 = vunpack.i.h.bf16 %v827_v12  ;;  %v828_v23 = vunpack.i.l.bf16 %v827_v12 }
 0x167   : > { %v461_v53 = vadd.f32 %v459_v38, %v433_v45  ;;  %v462_v57 = vadd.f32 %v460_v41, %v434_v50 }
 0x168   : > { %v483_v34 = vsel %vm482_vm4, %v828_v23, %v829_v22  ;;  %v484_v42 = vsel %vm482_vm4, %v829_v22, %v481_v13 }
 0x169   : > { %v832_v18 = vpop.permute.xlu1 %831  ;;  %v524_v19 = vpop.permute.xlu0 %523  ;;  %v487_v46 = vmul.f32 %v483_v34, %v969_v63  ;;  %v488_v54 = vmul.f32 %v484_v42, %v969_v63 }
 0x16a   : > { %v834_v43 = vunpack.i.h.bf16 %v832_v18  ;;  %v833_v44 = vunpack.i.l.bf16 %v832_v18 }
 0x16b   : > { %v489_v4 = vadd.f32 %v487_v46, %v461_v53  ;;  %v490_v13 = vadd.f32 %v488_v54, %v462_v57 }
 0x16c   : > { %v526_v58 = vsel %vm525_vm5, %v833_v44, %v834_v43  ;;  %v527_v5 = vsel %vm525_vm5, %v834_v43, %v524_v19 }
 0x16d   : > { %v837_v31 = vpop.permute.xlu1 %836  ;;  %v550_v32 = vpop.permute.xlu0 %549  ;;  %v530_v14 = vmul.f32 %v526_v58, %v971_v0  ;;  %v531_v17 = vmul.f32 %v527_v5, %v971_v0  ;;  %v502_v33 = vmul.f32 %v495_v39, %v489_v4 }
 0x16e   : > { %v839_v35 = vunpack.i.h.bf16 %v837_v31  ;;  %v838_v36 = vunpack.i.l.bf16 %v837_v31 }
 0x170   : > { %v552_v51 = vsel %vm551_vm6, %v838_v36, %v839_v35  ;;  %v553_v52 = vsel %vm551_vm6, %v839_v35, %v550_v32 }
 0x171   : > { %v842_v47 = vpop.permute.xlu1 %841  ;;  %v400_v48 = vpop.permute.xlu0 %399  ;;  %v556_v59 = vmul.f32 %v552_v51, %v973_v1  ;;  %v557_v6 = vmul.f32 %v553_v52, %v973_v1 }
 0x172   : > { %v844_v55 = vunpack.i.h.bf16 %v842_v47  ;;  %v843_v56 = vunpack.i.l.bf16 %v842_v47 }
 0x173   : > { %v558_v20 = vadd.f32 %v556_v59, %v530_v14  ;;  %v559_v25 = vadd.f32 %v557_v6, %v531_v17 }
 0x174   : > { %v402_v15 = vsel %vm401_vm7, %v843_v56, %v844_v55  ;;  %v403_v16 = vsel %vm401_vm7, %v844_v55, %v400_v48 }
 0x175   : > { %v847_v7 = vpop.permute.xlu1 %846  ;;  %v812_v9 = vpop.permute.xlu0 %811  ;;  %v406_v27 = vmul.f32 %v402_v15, %v975_v2  ;;  %v407_v0 = vmul.f32 %v403_v16, %v975_v2 }
 0x176   : > { %v849_v10 = vunpack.i.h.bf16 %v847_v7  ;;  %v848_v11 = vunpack.i.l.bf16 %v847_v7  ;;  %v814_v12 = vunpack.i.h.bf16 %v812_v9  ;;  %v813_v63 = vunpack.i.l.bf16 %v812_v9 }
 0x178   : > { %v361_v18 = vsel %vm359_vm8, %v814_v12, %v979_v8  ;;  %v360_v1 = vsel %vm359_vm8, %v813_v63, %v814_v12  ;;  %v580_v19 = vsel %vm579_vm9, %v848_v11, %v849_v10 }
 0x179   : > { %v365_v21 = vmul.f32 %v361_v18, %v967_v60  ;;  %v364_v22 = vmul.f32 %v360_v1, %v967_v60  ;;  %v584_v23 = vmul.f32 %v580_v19, %v977_v3  ;;  %v578_v24 = vpop.permute.xlu0 %577  ;;  %v503_v60 = vmul.f32 %v499_v40, %v490_v13 }
 0x17a   : > { %v581_v8 = vsel %vm579_vm9, %v849_v10, %v578_v24 }
 0x17b   : > { %v381_v28 = vadd.f32 %v986_v29, %v365_v21  ;;  %v380_v30 = vadd.f32 %v981_v26, %v364_v22  ;;  %v586_v31 = vadd.f32 %v584_v23, %v558_v20  ;;  %v585_v32 = vmul.f32 %v581_v8, %v977_v3 }
 0x17d   : > { %v409_v34 = vadd.f32 %v407_v0, %v381_v28  ;;  %v408_v35 = vadd.f32 %v406_v27, %v380_v30  ;;  %v587_v36 = vadd.f32 %v585_v32, %v559_v25  ;;  %v599_v38 = vmul.f32 %v592_v61, %v586_v31 }
 0x17f   : > { %v504_v37 = vadd.f32 %v502_v33, %v408_v35  ;;  %v505_v41 = vadd.f32 %v503_v60, %v409_v34  ;;  %v600_v42 = vmul.f32 %v596_v62, %v587_v36 }
 0x181   : > { %v601_v2 = vadd.f32 %v599_v38, %v504_v37  ;;  %v602_v43 = vadd.f32 %v600_v42, %v505_v41 }
 0x183   : > { %v753_v26 = vpack.c.bf16 %v602_v43, %v601_v2 }
 0x185   : > { %754 = vst.sshfl [vmem:[%s256_s30] sm:$0x33 pattern:$0x76325410] %v753_v26 }
 0x186 PF: > { %s14_s19 = sadd.s32 1, %s888_s19   ;;  %s1044_s15 = smov %s880_s17 }
 0x187   : > { %p11_p7 = scmp.ge.s32.totalorder %s14_s19, 6   ;;  %s1045_s16 = smov %s884_s18 }
 0x188   : > { %s1046_s17 = smov %s1049_s20  ;;  %s1047_s18 = smov %s1053_s21 }
 0x189   :  { %13 = sbr.rel (!%p11_p7) target bundleno = 3 (0x3), region = 81 }

// kernel: mdta_forward.7
= control target key start
LH: loop header
LB: loop body
LE: loop exit
PB: predicated region body
PF: predicated region fallthrough
CT: control target
= control target key end

     0   :  { %s765_s21 = smov 0   ;;  %s767_s22 = smov 0   ;;  %s818_s0 = inlined_call_operand.vmem [shape: f32[2,4,4], index: 0, kind: input, shape index: {}]   ;;  %s819_s1 = inlined_call_operand.vmem [shape: f32[2,4,1], index: 1, kind: input, shape index: {}]   ;;  %s820_s2 = inlined_call_operand.vmem [shape: f32[2,1,4], index: 2, kind: input, shape index: {}]   ;;  %s821_s3 = inlined_call_operand.vmem [shape: f32[4,4], index: 3, kind: input, shape index: {}]   ;;  %s822_s4 = inlined_call_operand.vmem [shape: f32[4,4], index: 4, kind: input, shape index: {}]   ;;  %s823_s5 = inlined_call_operand.vmem [shape: bf16[2,2,4,256], index: 5, kind: input, shape index: {}]   ;;  %s824_s6 = inlined_call_operand.vmem [shape: f32[2,4,256], index: 6, kind: output, shape index: {}]  }
   0x1   :  { %s769_s23 = smov 0  }
   0x2 LB: > { %s28_s24 = sadd.s32 1, %s721_s22  ;;  %p646_p0 = scmp.ge.s32.totalorder %s725_s23, 1  ;;  %s725_s23 = sphi %s769_s23, %s16_s23   ;;  %s721_s22 = sphi %s767_s22, %s826_s22   ;;  %s717_s21 = sphi %s765_s21, %s825_s21  }
   0x3   : > { %p30_p1 = scmp.ge.s32.totalorder %s28_s24, 2  ;;  %p260_p2 = scmp.lt.s32.totalorder %s725_s23, 3 }
   0x5   : > { %s828_s24 = smov (%p30_p1, %s28_s24), 0  ;;  %p261_p3 = pnand %p646_p0, %p260_p2 }
   0x6   : > { %p310_p4 = scmp.lt.s32.totalorder (!%p261_p3), %s717_s21, 1 }
   0x7   : > { %264 = sbr.rel (%p261_p3) target bundleno = 853 (0x355), region = 44 }
   0xc   : > { %v727_v0 = vmov 0   ;;  %s830_s21 = smov (!%p310_p4, %s717_s21), 1  ;;  %v359_v6 = vld [vmem:[%s821_s3] sm:$0xf]  ;;  %vm361_vm0 = vcmask 27648   ;;  %v728_v15 = vmov 0.0  }
   0xd   : > { %698 = vset.pattern.permute.xlu0 %v727_v0  ;;  %505 = vmatprep.mubr.bf16.mxu1 %v727_v0  ;;  %s647_s25 = sshll.u32 %s830_s21, 2  ;;  %s320_s10 = scalar_lea.vmem %s820_s2, %s830_s21  ;;  %vm729_vm1 = vmmov 0   ;;  %vm466_vm2 = vcmask 1041408   ;;  %vm378_vm3 = vcmask 1043456   ;;  %v373_v21 = vld [vmem:[%s822_s4] sm:$0xf] }
   0xe   : > { %s317_s28 = scalar_lea.vmem %s819_s1, %s647_s25  ;;  %s313_s7 = scalar_lea.vmem %s818_s0, %s647_s25  ;;  %v653_v3 = vld [vmem:[%s320_s10] ss:$0 sm:$0xff]  ;;  %666 = vmatprep.subr.mxu0 %v728_v15  ;;  %668 = vmatprep.mubr.msk.f32.mxu0 %vm729_vm1, %v728_v15  ;;  %vm374_vm4 = vcmask 31744  }
   0xf   : > { %v344_v1 = vld [vmem:[%s317_s28] sm:$0xf]  ;;  %s662_s13 = sshll.u32 %s830_s21, 3 }
  0x10   : > { %347 = vperm.xlu0 %698, %v344_v1   ;;  %v343_v2 = vld [vmem:[%s313_s7] sm:$0xf]  ;;  %s581_s16 = scalar_lea.vmem %s823_s5, %s662_s13  ;;  %s340_s21 = scalar_lea.vmem %s824_s6, %s662_s13 }
  0x11   : > { %v657_v16 = vld.sshfl [vmem:[%s581_s16 + $0x4] sm:$0x33 pattern:$0x76325410] }
  0x12   : > { %v462_v17 = vcombine.high %v657_v16, %v657_v16  ;;  %v468_v22 = vsel %vm466_vm2, %v657_v16, 0 }
  0x14   : > { %658 = vmatprep.subr.msk.bf16.mxu1 %vm466_vm2, %v462_v17 }
  0x15   : > { %488 = vmatpush1.bf16.msra.mxu1 %v468_v22 }
  0x8b   : > { %v348_v4 = vpop.permute.xlu0 %347 }
  0x8c   : > { %v350_v5 = vmul.f32 %v348_v4, %v343_v2 }
  0x8e   : > { %v358_v7 = vmul.f32 %v653_v3, %v350_v5 }
  0x90   : > { %v360_v8 = vadd.f32 %v359_v6, %v358_v7 }
  0x92   : > { %v362_v9 = vsel %vm361_vm0, %v360_v8, -inf }
  0x93   : > { %363 = vmax.xlane.f32.xlu0 %v362_v9 }
 0x11c   : > { %v364_v10 = vpop.xlane.xlu0 %363 }
 0x11d   : > { %v365_v11 = vsub.f32 %v360_v8, %v364_v10 }
 0x11f   : > { %v366_v12 = vmul.f32 1.442695, %v365_v11 }
 0x121   : > { %699 = vpow2.f32 %v366_v12 }
 0x12e   : > { %v700_v13 = vpop.eup %699 }
 0x12f   : > { %v368_v14 = vsel %vm361_vm0, %v700_v13, 0.0 }
 0x130   : > { %369 = vadd.xlane.f32.xlu1 %v368_v14 }
 0x1b9   : > { %v370_v18 = vpop.xlane.xlu1 %369 }
 0x1ba   : > { %701 = vrcp.f32 %v370_v18 }
 0x1c7   : > { %v702_v19 = vpop.eup %701 }
 0x1c8   : > { %v372_v20 = vmul.f32 %v702_v19, %v700_v13 }
 0x1ca   : > { %667 = vmatpush3.msk.msra.mxu0 %vm378_vm3, %v372_v20 }
 0x1cb   : > { %669 = vmatmul.mubr.msk.f32.vlgmr.msra.gmra.mxu0 %vm374_vm4, %v373_v21 }
 0x28b   : > { %v448_v23 = vpop.f32.mrf.mxu0 }
 0x28c   : > { %v452_v24 = vpack.c.bf16 %v448_v23, %v448_v23 }
 0x28d   : > { %v670_v25 = vpop.f32.mrf.mxu0 }
 0x28e   : > { %659 = vmatmul.mubr.msk.bf16.vlgmr.msra.gmra.mxu1 %vm374_vm4, %v452_v24 }
 0x34e   : > { %v507_v26 = vpop.f32.mrf.mxu1 }
 0x350   : > { %v509_v27 = vpop.f32.mrf.mxu1 }
 0x351   : > { %v516_v28 = vcombine.low %v507_v26, %v509_v27 }
 0x352   : > { %v511_v29 = vpop.f32.mrf.mxu1 }
 0x353   : > { %518 = vst [vmem:[%s340_s21] sm:$0xff] %v516_v28 }
 0x354   : > { %v512_v30 = vpop.f32.mrf.mxu1 }
 0x355 PF: > { %s16_s23 = sadd.s32 1, %s725_s23   ;;  %s825_s21 = smov %s721_s22 }
 0x356   : > { %p13_p5 = scmp.ge.s32.totalorder %s16_s23, 4   ;;  %s826_s22 = smov %s828_s24 }
 0x358   :  { %15 = sbr.rel (!%p13_p5) target bundleno = 2 (0x2), region = 83 }

// kernel: mdta_forward.5
= control target key start
LH: loop header
LB: loop body
LE: loop exit
PB: predicated region body
PF: predicated region fallthrough
CT: control target
= control target key end

     0   :  { %s2252_s0 = inlined_call_operand.vmem [shape: bf16[2,4,16,16], index: 0, kind: input, shape index: {}]   ;;  %s2253_s1 = inlined_call_operand.vmem [shape: bf16[24,16], index: 1, kind: input, shape index: {}]   ;;  %s2254_s2 = inlined_call_operand.vmem [shape: bf16[16,24], index: 2, kind: input, shape index: {}]   ;;  %s2255_s3 = inlined_call_operand.vmem [shape: bf16[2,16,10], index: 3, kind: input, shape index: {}]   ;;  %s2256_s4 = inlined_call_operand.vmem [shape: bf16[2,10,16], index: 4, kind: input, shape index: {}]   ;;  %s2257_s5 = inlined_call_operand.vmem [shape: f32[4,27], index: 5, kind: input, shape index: {}]   ;;  %s2258_s6 = inlined_call_operand.vmem [shape: bf16[2,4,16,16], index: 6, kind: output, shape index: {}]  }
   0x1   :  { %2262 = sst [smem:[#allocation9_spill]] %s2252_s0 }
   0x2   :  { %2263 = sst [smem:[#allocation10_spill]] %s2253_s1 }
   0x3   :  { %2264 = sst [smem:[#allocation11_spill]] %s2254_s2 }
   0x4   :  { %2265 = sst [smem:[#allocation12_spill]] %s2257_s5 }
   0x5   :  { %11 = vsyncpa [#allocation3], 0  ;;  %s1639_s21 = smov 0   ;;  %s1641_s22 = smov 0  }
   0x6   :  { %s1643_s23 = smov 0   ;;  %s1645_s24 = smov 0  }
   0x7   :  { %s1647_s25 = smov 0  }
   0x8 LB: > { %2266 = sst [smem:[#allocation5_spill]] %s1588_s23  ;;  %s1367_s26 = sadd.s32 4294967295, %s1596_s25   ;;  %s1596_s25 = sphi %s1647_s25, %s17_s25   ;;  %s1592_s24 = sphi %s1645_s24, %s2280_s24   ;;  %s1588_s23 = sphi %s1643_s23, %s2279_s23   ;;  %s1584_s22 = sphi %s1641_s22, %s2278_s22   ;;  %s1580_s21 = sphi %s1639_s21, %s2277_s21  }
   0x9   : > { %2267 = sst [smem:[#allocation6_spill]] %s1592_s24  ;;  %s26_s27 = sadd.s32 1, %s1588_s23 }
   0xa   : > { %p27_p0 = scmp.ge.s32.totalorder %s26_s27, 4  ;;  %s29_s28 = sadd.s32 1, %s1592_s24 }
   0xb   : > { %p1369_p1 = scmp.ge.s32.totalorder %s1596_s25, 1  ;;  %p195_p2 = scmp.lt.s32.totalorder %s1596_s25, 9 }
   0xc   : > { %s2282_s27 = smov (%p27_p0, %s26_s27), 0  ;;  %s2284_s28 = smov (!%p27_p0, %s29_s28), %s1592_s24 }
   0xd   : > { %2268 = sst [smem:[#allocation7_spill]] %s2282_s27  ;;  %p1672_p3 = pnand %p1369_p1, %p195_p2 }
   0xe   : > { %p31_p4 = scmp.ge.s32.totalorder %s2284_s28, 2  ;;  %p1676_p5 = scmp.eq.s32.totalorder %s1367_s26, 0 }
   0xf   : > { %p1479_p6 = pneg %p1672_p3  ;;  %s2271_s5 = sld [smem:[#allocation12_spill]] }
  0x10   : > { %s2286_s28 = smov (%p31_p4, %s2284_s28), 0 }
  0x11   : > { %2272 = sst [smem:[#allocation8_spill]] %s2286_s28  ;;  %p1480_p7 = pnand %p1676_p5, %p1479_p6 }
  0x13   : > { %p1541_p9 = pneg %p1480_p7 }
  0x15   : > { %s220_s9 = sshll.u32 %s2271_s5, 4  ;;  %s221_s9 = int_to_ptr.vmem [resolvable:$true] %s220_s9 }
  0x16   : > { %s1539_s10 = scalar_lea.vmem %s221_s9, 64  ;;  %p1547_p12 = scmp.lt.s32.totalorder %s221_s9, %s221_s9 }
  0x17   : > { %p1540_p8 = scmp.ne.s32.totalorder %s221_s9, %s1539_s10  ;;  %p1548_p13 = scmp.lt.s32.totalorder %s1539_s10, %s1539_s10 }
  0x19   : > { %p1542_p10 = pnand %p1541_p9, %p1540_p8  ;;  %p1549_p0 = por %p1548_p13, %p1547_p12 }
  0x1b   : > { %p1543_p11 = pneg %p1542_p10 }
  0x1d   : > { %p1550_p1 = pnand %p1549_p0, %p1543_p11 }
  0x1f   : > { %1553 = shalt.err (!%p1550_p1)
}
  0x20   : > { %s1598_s11 = smov [#allocation2]   ;;  %245 = sbr.rel (%p1672_p3) target bundleno = 1136 (0x470), region = 44 }
  0x21   : > { %1482 = dma.vmem_to_smem (!%p1480_p7), %s221_s9, 64, %s1598_s11, [#allocation3]  }
  0x25   : > { %1575 = dma.done.wait (%p1676_p5), [#allocation3], 64  }
  0x26   : > { %1577 = vsyncadd (%p1676_p5), [#allocation3], 4294967232 }
  0x27   : > { %251 = sfence }
  0x28   : > { %p284_p2 = scmp.lt.s32.totalorder %s1584_s22, 1  ;;  %p286_p4 = scmp.lt.s32.totalorder %s1580_s21, 3  ;;  %vm322_vm0 = vcmask 130048   ;;  %vm483_vm1 = vcmask 1046528   ;;  %vm534_vm2 = vcmask 1045504   ;;  %vm1602_vm3 = vmmov 0  }
  0x29   : > { %s2273_s1 = sld [smem:[#allocation10_spill]]  ;;  %s1721_s8 = sshll.u32 %s1580_s21, 7  ;;  %vm945_vm4 = vcmask 1044480   ;;  %vm941_vm5 = vcmask 80896   ;;  %vm1256_vm6 = vcmask 125952  }
  0x2a   : > { %s2288_s22 = smov (!%p284_p2, %s1584_s22), 1  ;;  %s2274_s0 = sld [smem:[#allocation9_spill]] }
  0x2b   : > { %s287_s14 = scalar_select %p286_p4, %s1580_s21, 3 }
  0x2c   : > { %s1375_s15 = sshll.u32 %s2288_s22, 3  ;;  %s2275_s2 = sld [smem:[#allocation11_spill]] }
  0x2d   : > { %s1374_s16 = sshll.u32 %s287_s14, 1  ;;  %s813_s9 = sadd.s32 20, %s1721_s8 }
  0x2e   : > { %s1703_s17 = sadd.s32 %s1375_s15, %s1374_s16  ;;  %s798_s10 = sadd.s32 19, %s1721_s8 }
  0x2f   : > { %v1532_v0 = vld [vmem:[%s2273_s1] sm:$0xff]   ;;  %s2259_s18 = sshll.u32 %s1703_s17, 2  ;;  %v1533_v2 = vld [vmem:[%s2273_s1 + $0x8] ss:$0 sps:$4 sm:$0xff]   ;;  %s677_s11 = sadd.s32 11, %s1721_s8 }
  0x30   : > { %1429 = vmatprep.mubr.msk.bf16.mxu0 %vm322_vm0, %v1532_v0  ;;  %s292_s26 = scalar_lea.vmem %s2274_s0, %s2259_s18  ;;  %s1726_s12 = sld [smem:[#allocation2 + %s813_s9]] }
  0x31   : > { %v1531_v1 = vld [vmem:[%s292_s26] sm:$0xff]   ;;  %s662_s13 = sadd.s32 10, %s1721_s8  ;;  %s1729_s21 = sld [smem:[#allocation2 + %s798_s10]] }
  0x32   : > { %1427 = vmatprep.subr.bf16.mxu0 %v1531_v1  ;;  %v1534_v3 = vld [vmem:[%s2275_s2] sm:$0xff]   ;;  %s842_s14 = sadd.s32 22, %s1721_s8  ;;  %s1732_s15 = sld [smem:[#allocation2 + %s677_s11]] }
  0x33   : > { %1428 = vmatpush3.bf16.msra.mxu0 %v1531_v1  ;;  %1433 = vmatprep.subr.bf16.mxu1 %v1534_v3  ;;  %s860_s16 = sadd.s32 23, %s1721_s8  ;;  %s1735_s19 = sld [smem:[#allocation2 + %s662_s13]] }
  0x34   : > { %1434 = vmatpush3.bf16.msra.mxu1 %v1534_v3  ;;  %s892_s20 = sadd.s32 25, %s1721_s8  ;;  %s1738_s26 = sld [smem:[#allocation2 + %s842_s14]] }
  0x35   : > { %s910_s29 = sadd.s32 26, %s1721_s8  ;;  %s1741_s30 = sld [smem:[#allocation2 + %s860_s16]] }
  0x36   : > { %1430 = vmatmul.mubr.msk.bf16.vlgmr.msra.gmra.mxu0 %vm322_vm0, %v1533_v2  ;;  %s1743_s22 = sld [smem:[#allocation2 + %s892_s20]]  ;;  %s706_s7 = sadd.s32 13, %s1721_s8  ;;  %v815_v10 = vstv %s1726_s12 }
  0x37   : > { %s1746_s9 = sld [smem:[#allocation2 + %s910_s29]]  ;;  %s724_s10 = sadd.s32 14, %s1721_s8  ;;  %v800_v11 = vstv %s1729_s21 }
  0x38   : > { %s756_s11 = sadd.s32 16, %s1721_s8  ;;  %s1750_s13 = sld [smem:[#allocation2 + %s706_s7]]  ;;  %v679_v16 = vstv %s1732_s15 }
  0x39   : > { %s509_s18 = sadd.s32 5, %s1721_s8  ;;  %s1753_s14 = sld [smem:[#allocation2 + %s724_s10]]  ;;  %v664_v17 = vstv %s1735_s19 }
  0x3a   : > { %s542_s0 = sadd.s32 7, %s1721_s8  ;;  %s1756_s16 = sld [smem:[#allocation2 + %s756_s11]]  ;;  %v844_v18 = vstv %s1738_s26 }
  0x3b   : > { %s560_s20 = sadd.s32 8, %s1721_s8  ;;  %s1759_s1 = sld [smem:[#allocation2 + %s509_s18]]  ;;  %v862_v20 = vstv %s1741_s30 }
  0x3c   : > { %s793_s29 = sadd.s32 18, %s1721_s8  ;;  %s1762_s2 = sld [smem:[#allocation2 + %s542_s0]]  ;;  %v894_v21 = vstv %s1743_s22 }
  0x3d   : > { %s828_s5 = sadd.s32 21, %s1721_s8  ;;  %s1765_s7 = sld [smem:[#allocation2 + %s560_s20]]  ;;  %v912_v22 = vstv %s1746_s9 }
  0x3e   : > { %s878_s28 = sadd.s32 24, %s1721_s8  ;;  %s1768_s27 = sld [smem:[#allocation2 + %s793_s29]]  ;;  %v708_v26 = vstv %s1750_s13 }
  0x3f   : > { %s657_s10 = sadd.s32 9, %s1721_s8  ;;  %s1771_s24 = sld [smem:[#allocation2 + %s828_s5]]  ;;  %v726_v28 = vstv %s1753_s14 }
  0x40   : > { %s692_s11 = sadd.s32 12, %s1721_s8  ;;  %s1776_s0 = sld [smem:[#allocation2 + %s878_s28]]  ;;  %v758_v29 = vstv %s1756_s16 }
  0x41   : > { %s742_s18 = sadd.s32 15, %s1721_s8  ;;  %s1779_s23 = sld [smem:[#allocation2 + %s657_s10]]  ;;  %v511_v30 = vstv %s1759_s1 }
  0x42   : > { %s1783_s20 = sld [smem:[#allocation2 + %s692_s11]]  ;;  %s476_s29 = sadd.s32 3, %s1721_s8  ;;  %v544_v31 = vstv %s1762_s2 }
  0x43   : > { %s1790_s5 = sld [smem:[#allocation2 + %s742_s18]]  ;;  %s527_s28 = sadd.s32 6, %s1721_s8  ;;  %v562_v32 = vstv %s1765_s7 }
  0x44   : > { %s1799_s21 = sld [smem:[#allocation2 + %s1721_s8]]  ;;  %s1599_s10 = smov 126   ;;  %v795_v33 = vstv %s1768_s27 }
  0x45   : > { %s1600_s11 = smov 127   ;;  %s1803_s18 = sld [smem:[#allocation2 + %s476_s29]]  ;;  %v830_v36 = vstv %s1771_s24 }
  0x46   : > { %s1808_s19 = sld [smem:[#allocation2 + %s527_s28]]  ;;  %v880_v37 = vstv %s1776_s0  ;;  %s774_s1 = sadd.s32 17, %s1721_s8 }
  0x47   : > { %v659_v44 = vstv %s1779_s23  ;;  %s2023_s2 = sld [smem:[#allocation2 + %s774_s1]]  ;;  %s446_s24 = sadd.s32 1, %s1721_s8 }
  0x48   : > { %v694_v45 = vstv %s1783_s20  ;;  %s447_s12 = sld [smem:[#allocation2 + %s446_s24]]  ;;  %s461_s15 = sadd.s32 2, %s1721_s8 }
  0x49   : > { %v744_v47 = vstv %s1790_s5  ;;  %s491_s26 = sadd.s32 4, %s1721_s8  ;;  %s462_s30 = sld [smem:[#allocation2 + %s461_s15]] }
  0x4a   : > { %v1850_v48 = vstv %s1799_s21  ;;  %s492_s22 = sld [smem:[#allocation2 + %s491_s26]]  ;;  %s1603_s23 = smov 116  }
  0x4b   : > { %v1856_v51 = vstv %s1803_s18  ;;  %s2276_s20 = sshll.u32 %s1703_s17, 2 }
  0x4c   : > { %v1859_v52 = vstv %s1808_s19  ;;  %s301_s28 = scalar_lea.vmem %s2258_s6, %s2276_s20 }
  0xf6   : > { %v1431_v4 = vpop.f32.mrf.mxu0 }
  0xf7   : > { %v378_v9 = vpack.c.bf16 %v1431_v4, %v1431_v4 }
  0xf8   : > { %v363_v5 = vpop.f32.mrf.mxu0 }
  0xfa   : > { %v1432_v6 = vpop.f32.mrf.mxu0 }
  0xfc   : > { %v366_v7 = vpop.f32.mrf.mxu0 }
  0xfd   : > { %v377_v8 = vpack.c.bf16 %v366_v7, %v363_v5 }
  0xff   : > { %1435 = vmatprep.mubr.msk.bf16.mxu1 %vm322_vm0, %v377_v8 }
 0x100   : > { %1436 = vmatmul.mubr.msk.bf16.vlgmr.msra.gmra.mxu1 %vm322_vm0, %v378_v9 }
 0x1c0   : > { %v1781_v12 = vpop.f32.mrf.mxu1 }
 0x1c1   : > { %v817_v13 = vmul.f32 %v1781_v12, %v815_v10  ;;  %v802_v14 = vmul.f32 %v1781_v12, %v800_v11  ;;  %v846_v25 = vmul.f32 %v1781_v12, %v844_v18  ;;  %v864_v34 = vmul.f32 %v1781_v12, %v862_v20 }
 0x1c2   : > { %v1793_v15 = vpop.f32.mrf.mxu1  ;;  %v1828_v35 = vmul.f32 %v1781_v12, %v894_v21  ;;  %v1837_v41 = vmul.f32 %v1781_v12, %v912_v22  ;;  %v1877_v63 = vmul.f32 %v1781_v12, %v511_v30  ;;  %v1883_v3 = vmul.f32 %v1781_v12, %v544_v31 }
 0x1c3   : > { %822 = vrot.lane.b32.xlu1 %v817_v13, %s1599_s10  ;;  %807 = vrot.lane.b32.xlu0 %v802_v14, %s1600_s11  ;;  %v680_v23 = vmul.f32 %v679_v16, %v1793_v15  ;;  %v665_v24 = vmul.f32 %v664_v17, %v1793_v15  ;;  %v850_v38 = vrot.slane %v846_v25, 1  ;;  %v709_v42 = vmul.f32 %v708_v26, %v1793_v15 }
 0x1c4   : > { %v1438_v19 = vpop.f32.mrf.mxu1  ;;  %v1841_v43 = vmul.f32 %v726_v28, %v1793_v15  ;;  %v868_v49 = vrot.slane %v864_v34, 1  ;;  %v900_v54 = vrot.slane %v1828_v35, 2  ;;  %v918_v56 = vrot.slane %v1837_v41, 2 }
 0x1c5   : > { %v713_v58 = vrot.slane %v709_v42, 1  ;;  %v512_v2 = vmul.f32 %v511_v30, %v1793_v15  ;;  %v614_v6 = vrot.slane %v1877_v63, 1  ;;  %v545_v8 = vmul.f32 %v544_v31, %v1793_v15 }
 0x1c6   : > { %v1816_v27 = vpop.f32.mrf.mxu1  ;;  %v731_v60 = vrot.slane %v1841_v43, 1  ;;  %v1895_v13 = vmul.f32 %v1781_v12, %v562_v32  ;;  %v563_v25 = vmul.f32 %v562_v32, %v1793_v15  ;;  %v1946_v34 = vmul.f32 %v1781_v12, %v830_v36 }
 0x1c7   : > { %684 = vrot.lane.b32.xlu0 %v680_v23, %s1599_s10  ;;  %669 = vrot.lane.b32.xlu1 %v665_v24, %s1600_s11  ;;  %v845_v39 = vmul.f32 %v844_v18, %v1816_v27  ;;  %v801_v40 = vmul.f32 %v800_v11, %v1816_v27  ;;  %v863_v46 = vmul.f32 %v862_v20, %v1816_v27  ;;  %v516_v9 = vrot.slane %v512_v2, 1 }
 0x1c8   : > { %v1853_v50 = vmul.f32 %v708_v26, %v1816_v27  ;;  %v816_v53 = vmul.f32 %v815_v10, %v1816_v27  ;;  %v1867_v57 = vmul.f32 %v894_v21, %v1816_v27  ;;  %v666_v59 = vmul.f32 %v664_v17, %v1816_v27 }
 0x1c9   : > { %v849_v55 = vrot.slane %v845_v39, 1  ;;  %v867_v61 = vrot.slane %v863_v46, 1  ;;  %v1874_v62 = vmul.f32 %v726_v28, %v1816_v27  ;;  %v513_v0 = vmul.f32 %v511_v30, %v1816_v27 }
 0x1ca   : > { %v714_v1 = vrot.slane %v1853_v50, 1  ;;  %v546_v4 = vmul.f32 %v544_v31, %v1816_v27  ;;  %v634_v10 = vrot.slane %v1883_v3, 2  ;;  %v681_v17 = vmul.f32 %v679_v16, %v1816_v27 }
 0x1cb   : > { %854 = vrot.lane.b32.xlu1 %v850_v38, %s1600_s11  ;;  %805 = vrot.lane.b32.xlu0 %v801_v40, %s1600_s11  ;;  %v851_v5 = vsel %vm483_vm1, %v849_v55, %v850_v38  ;;  %v1888_v7 = vrot.slane %v513_v0, 1  ;;  %v869_v14 = vsel %vm483_vm1, %v867_v61, %v868_v49  ;;  %v549_v19 = vrot.slane %v545_v8, 2 }
 0x1cc   : > { %v1892_v11 = vrot.slane %v546_v4, 2  ;;  %v715_v20 = vsel %vm483_vm1, %v713_v58, %v714_v1  ;;  %v564_v23 = vmul.f32 %v562_v32, %v1816_v27  ;;  %v1933_v26 = vmul.f32 %v1781_v12, %v795_v33 }
 0x1cd   : > { %v1909_v18 = vsel %vm483_vm1, %v1888_v7, %v614_v6  ;;  %v1916_v21 = vsel %vm483_vm1, %v516_v9, %v1888_v7  ;;  %v1938_v28 = vmul.f32 %v659_v44, %v1793_v15  ;;  %v646_v30 = vrot.slane %v1895_v13, 2 }
 0x1ce   : > { %v1922_v16 = vsel %vm534_vm2, %v1892_v11, %v634_v10  ;;  %v1927_v24 = vsel %vm534_vm2, %v549_v19, %v1892_v11  ;;  %v1941_v31 = vrot.slane %v564_v23, 2  ;;  %v831_v32 = vmul.f32 %v830_v36, %v1816_v27 }
 0x1cf   : > { %872 = vrot.lane.b32.xlu1 %v868_v49, %s1599_s10  ;;  %820 = vrot.lane.b32.xlu0 %v816_v53, %s1599_s10  ;;  %v567_v38 = vrot.slane %v563_v25, 2  ;;  %v1958_v39 = vmul.f32 %v1781_v12, %v880_v37  ;;  %v881_v40 = vmul.f32 %v880_v37, %v1816_v27  ;;  %v695_v42 = vmul.f32 %v694_v45, %v1793_v15 }
 0x1d0   : > { %v1970_v36 = vsel %vm534_vm2, %v1941_v31, %v646_v30  ;;  %v836_v46 = vrot.slane %v1946_v34, 1  ;;  %v835_v49 = vrot.slane %v831_v32, 1  ;;  %v1976_v53 = vmul.f32 %v694_v45, %v1816_v27 }
 0x1d1   : > { %v732_v37 = vrot.slane %v1874_v62, 1  ;;  %v1981_v55 = vsel %vm534_vm2, %v567_v38, %v1941_v31  ;;  %v886_v58 = vrot.slane %v1958_v39, 2  ;;  %v885_v61 = vrot.slane %v881_v40, 2 }
 0x1d2   : > { %v1988_v0 = vsel %vm483_vm1, %v835_v49, %v836_v46  ;;  %v699_v2 = vrot.slane %v695_v42, 1  ;;  %v700_v45 = vrot.slane %v1976_v53, 1  ;;  %v745_v4 = vmul.f32 %v744_v47, %v1793_v15 }
 0x1d3   : > { %904 = vrot.lane.b32.xlu1 %v900_v54, %s1600_s11  ;;  %852 = vrot.lane.b32.xlu0 %v851_v5, %s1600_s11  ;;  %v899_v62 = vrot.slane %v1867_v57, 2  ;;  %v2000_v5 = vsel %vm534_vm2, %v885_v61, %v886_v58  ;;  %v2005_v8 = vmul.f32 %v744_v47, %v1816_v27  ;;  %v2009_v9 = vmul.f32 %v1781_v12, %v1850_v48 }
 0x1d4   : > { %v2017_v57 = vsel %vm483_vm1, %v699_v2, %v700_v45  ;;  %v2021_v19 = vmul.f32 %v1850_v48, %v1793_v15  ;;  %v480_v23 = vmul.f32 %v1856_v51, %v1816_v27  ;;  %v479_v25 = vmul.f32 %v1856_v51, %v1793_v15 }
 0x1d5   : > { %v750_v47 = vrot.slane %v2005_v8, 2  ;;  %v733_v32 = vsel %vm483_vm1, %v731_v60, %v732_v37  ;;  %v2039_v38 = vmul.f32 %v1781_v12, %v1859_v52  ;;  %v531_v40 = vmul.f32 %v1859_v52, %v1816_v27 }
 0x1d6   : > { %v530_v42 = vmul.f32 %v1859_v52, %v1793_v15  ;;  %v2053_v60 = vrot.slane %v480_v23, 1  ;;  %v484_v49 = vrot.slane %v479_v25, 1  ;;  %v759_v61 = vmul.f32 %v758_v29, %v1793_v15 }
 0x1d7   : > { %922 = vrot.lane.b32.xlu1 %v918_v56, %s1599_s10  ;;  %716 = vrot.lane.b32.xlu0 %v715_v20, %s1600_s11  ;;  %v2028_v20 = vmul.f32 %v1781_v12, %v1856_v51  ;;  %v626_v52 = vrot.slane %v2039_v38, 2  ;;  %v2059_v2 = vrot.slane %v531_v40, 2  ;;  %v445_v8 = vmul.f32 %v1850_v48, %v1816_v27 }
 0x1d8   : > { %v2072_v23 = vsel %vm483_vm1, %v484_v49, %v2053_v60  ;;  %v763_v35 = vrot.slane %v759_v61, 2 }
 0x1d9   : > { %v594_v51 = vrot.slane %v2028_v20, 1 }
 0x1db   : > { %870 = vrot.lane.b32.xlu0 %v869_v14, %s1599_s10  ;;  %671 = vrot.lane.b32.xlu1 %v666_v59, %s1600_s11  ;;  %v760_v14 = vmul.f32 %v758_v29, %v1816_v27  ;;  %v749_v59 = vrot.slane %v745_v4, 2  ;;  %v913_v4 = vmul.f32 %v912_v22, %v1816_v27  ;;  %v901_v29 = vsel %vm534_vm2, %v899_v62, %v900_v54 }
 0x1dc   : > { %v2081_v22 = vsel %vm534_vm2, %v2059_v2, %v626_v52  ;;  %v776_v54 = vstv %s2023_s2 }
 0x1dd   : > { %v2050_v43 = vsel %vm534_vm2, %v749_v59, %v750_v47  ;;  %v2068_v59 = vsel %vm483_vm1, %v2053_v60, %v594_v51  ;;  %v764_v25 = vrot.slane %v760_v14, 2  ;;  %v917_v14 = vrot.slane %v913_v4, 2 }
 0x1de   : > { %v778_v40 = vmul.f32 %v776_v54, %v1816_v27 }
 0x1df   : > { %734 = vrot.lane.b32.xlu0 %v733_v32, %s1599_s10  ;;  %686 = vrot.lane.b32.xlu1 %v681_v17, %s1599_s10  ;;  %v535_v17 = vrot.slane %v530_v42, 2  ;;  %v765_v62 = vsel %vm534_vm2, %v763_v35, %v764_v25  ;;  %v777_v42 = vmul.f32 %v776_v54, %v1793_v15  ;;  %v919_v50 = vsel %vm534_vm2, %v917_v14, %v918_v56 }
 0x1e1   : > { %v2085_v32 = vsel %vm534_vm2, %v535_v17, %v2059_v2  ;;  %v781_v49 = vrot.slane %v777_v42, 2  ;;  %v448_v17 = vstv %s447_s12 }
 0x1e2   : > { %v580_v41 = vmul.f32 %v1781_v12, %v448_v17  ;;  %v450_v56 = vmul.f32 %v448_v17, %v1816_v27 }
 0x1e3   : > { %902 = vrot.lane.b32.xlu0 %v901_v29, %s1600_s11  ;;  %718 = vrot.lane.b32.xlu1 %v714_v1, %s1600_s11  ;;  %v782_v1 = vrot.slane %v778_v40, 2  ;;  %v449_v29 = vmul.f32 %v448_v17, %v1793_v15 }
 0x1e5   : > { %v783_v61 = vsel %vm534_vm2, %v781_v49, %v782_v1 }
 0x1e7   : > { %766 = vrot.lane.b32.xlu0 %v765_v62, %s1600_s11  ;;  %736 = vrot.lane.b32.xlu1 %v732_v37, %s1599_s10  ;;  %v463_v37 = vstv %s462_s30 }
 0x1e8   : > { %v465_v4 = vmul.f32 %v463_v37, %v1816_v27  ;;  %v464_v62 = vmul.f32 %v463_v37, %v1793_v15  ;;  %v586_v14 = vmul.f32 %v1781_v12, %v463_v37 }
 0x1eb   : > { %920 = vrot.lane.b32.xlu0 %v919_v50, %s1599_s10  ;;  %768 = vrot.lane.b32.xlu1 %v764_v25, %s1600_s11  ;;  %v493_v25 = vstv %s492_s22 }
 0x1ec   : > { %v495_v35 = vmul.f32 %v493_v25, %v1816_v27  ;;  %v600_v54 = vmul.f32 %v1781_v12, %v493_v25  ;;  %v494_v50 = vmul.f32 %v493_v25, %v1793_v15  ;;  %v1601_v12 = vmov 0.0  }
 0x1ed   : > { %1439 = vmatprep.subr.bf16.mxu0 %v1601_v12  ;;  %1445 = vmatprep.subr.bf16.mxu1 %v1601_v12 }
 0x1ee   : > { %v499_v40 = vrot.slane %v495_v35, 1  ;;  %v602_v42 = vrot.slane %v600_v54, 1  ;;  %v498_v49 = vrot.slane %v494_v50, 1  ;;  %1441 = vmatprep.mubr.msk.bf16.mxu0 %vm1602_vm3, %v1601_v12  ;;  %1447 = vmatprep.mubr.msk.bf16.mxu1 %vm1602_vm3, %v1601_v12  ;;  %v661_v35 = vmul.f32 %v659_v44, %v1816_v27 }
 0x1ef   : > { %784 = vrot.lane.b32.xlu0 %v783_v61, %s1599_s10  ;;  %786 = vrot.lane.b32.xlu1 %v782_v1, %s1599_s10 }
 0x1f0   : > { %v603_v1 = vsel %vm483_vm1, %v499_v40, %v602_v42  ;;  %v500_v61 = vsel %vm483_vm1, %v498_v49, %v499_v40 }
 0x1f3   : > { %582 = vrot.lane.b32.xlu1 %v580_v41, %s1600_s11  ;;  %455 = vrot.lane.b32.xlu0 %v450_v56, %s1600_s11 }
 0x1f7   : > { %470 = vrot.lane.b32.xlu1 %v465_v4, %s1599_s10  ;;  %453 = vrot.lane.b32.xlu0 %v449_v29, %s1600_s11 }
 0x1fb   : > { %468 = vrot.lane.b32.xlu1 %v464_v62, %s1599_s10  ;;  %588 = vrot.lane.b32.xlu0 %v586_v14, %s1599_s10 }
 0x1ff   : > { %606 = vrot.lane.b32.xlu1 %v602_v42, %s1600_s11  ;;  %604 = vrot.lane.b32.xlu0 %v603_v1, %s1600_s11 }
 0x203   : > { %503 = vrot.lane.b32.xlu1 %v499_v40, %s1600_s11  ;;  %501 = vrot.lane.b32.xlu0 %v500_v61, %s1600_s11 }
 0x207   : > { %618 = vrot.lane.b32.xlu1 %v614_v6, %s1599_s10  ;;  %616 = vrot.lane.b32.xlu0 %v1909_v18, %s1599_s10 }
 0x20b   : > { %521 = vrot.lane.b32.xlu1 %v1888_v7, %s1599_s10  ;;  %519 = vrot.lane.b32.xlu0 %v1916_v21, %s1599_s10 }
 0x20f   : > { %638 = vrot.lane.b32.xlu1 %v634_v10, %s1600_s11  ;;  %636 = vrot.lane.b32.xlu0 %v1922_v16, %s1600_s11 }
 0x213   : > { %554 = vrot.lane.b32.xlu1 %v1892_v11, %s1600_s11  ;;  %552 = vrot.lane.b32.xlu0 %v1927_v24, %s1600_s11  ;;  %v796_v24 = vmul.f32 %v795_v33, %v1816_v27 }
 0x217   : > { %650 = vrot.lane.b32.xlu1 %v646_v30, %s1599_s10  ;;  %648 = vrot.lane.b32.xlu0 %v1970_v36, %s1599_s10 }
 0x21b   : > { %572 = vrot.lane.b32.xlu1 %v1941_v31, %s1599_s10  ;;  %570 = vrot.lane.b32.xlu0 %v1981_v55, %s1599_s10 }
 0x235   : > { %v823_v15 = vpop.permute.xlu1 %822  ;;  %v808_v63 = vpop.permute.xlu0 %807 }
 0x236   : > { %v812_v3 = vadd.f32 %v808_v63, %v1933_v26 }
 0x238   : > { %v827_v6 = vadd.f32 %v823_v15, %v812_v3 }
 0x239   : > { %v685_v7 = vpop.permute.xlu0 %684  ;;  %v670_v10 = vpop.permute.xlu1 %669 }
 0x23a   : > { %v675_v11 = vadd.f32 %v670_v10, %v1938_v28  ;;  %v841_v13 = vadd.f32 %v836_v46, %v827_v6 }
 0x23c   : > { %v690_v18 = vadd.f32 %v685_v7, %v675_v11 }
 0x23d   : > { %v855_v21 = vpop.permute.xlu1 %854  ;;  %v806_v16 = vpop.permute.xlu0 %805 }
 0x23e   : > { %v704_v30 = vadd.f32 %v2017_v57, %v690_v18  ;;  %v859_v31 = vadd.f32 %v855_v21, %v841_v13  ;;  %v811_v36 = vadd.f32 %v806_v16, %v796_v24 }
 0x241   : > { %v873_v26 = vpop.permute.xlu1 %872  ;;  %v821_v55 = vpop.permute.xlu0 %820 }
 0x242   : > { %v877_v17 = vadd.f32 %v873_v26, %v859_v31  ;;  %v826_v41 = vadd.f32 %v821_v55, %v811_v36 }
 0x244   : > { %v891_v28 = vadd.f32 %v886_v58, %v877_v17  ;;  %v840_v34 = vadd.f32 %v1988_v0, %v826_v41 }
 0x245   : > { %v905_v46 = vpop.permute.xlu1 %904  ;;  %v853_v56 = vpop.permute.xlu0 %852 }
 0x246   : > { %v858_v29 = vadd.f32 %v853_v56, %v840_v34  ;;  %v909_v44 = vadd.f32 %v905_v46, %v891_v28 }
 0x249   : > { %v923_v37 = vpop.permute.xlu1 %922  ;;  %v717_v4 = vpop.permute.xlu0 %716 }
 0x24a   : > { %v722_v54 = vadd.f32 %v717_v4, %v704_v30  ;;  %v927_v11 = vadd.f32 %v923_v37, %v909_v44 }
 0x24d   : > { %v871_v33 = vpop.permute.xlu0 %870  ;;  %v672_v25 = vpop.permute.xlu1 %671 }
 0x24e   : > { %v876_v57 = vadd.f32 %v871_v33, %v858_v29  ;;  %v676_v62 = vadd.f32 %v672_v25, %v661_v35 }
 0x250   : > { %v890_v14 = vadd.f32 %v2000_v5, %v876_v57 }
 0x251   : > { %v735_v40 = vpop.permute.xlu0 %734  ;;  %v687_v39 = vpop.permute.xlu1 %686 }
 0x252   : > { %v740_v58 = vadd.f32 %v735_v40, %v722_v54  ;;  %v691_v42 = vadd.f32 %v687_v39, %v676_v62 }
 0x254   : > { %v705_v0 = vadd.f32 %v700_v45, %v691_v42  ;;  %v754_v50 = vadd.f32 %v2050_v43, %v740_v58 }
 0x255   : > { %v903_v1 = vpop.permute.xlu0 %902  ;;  %v719_v49 = vpop.permute.xlu1 %718 }
 0x256   : > { %v723_v61 = vadd.f32 %v719_v49, %v705_v0  ;;  %v908_v6 = vadd.f32 %v903_v1, %v890_v14 }
 0x259   : > { %v767_v15 = vpop.permute.xlu0 %766  ;;  %v737_v63 = vpop.permute.xlu1 %736 }
 0x25a   : > { %v741_v3 = vadd.f32 %v737_v63, %v723_v61  ;;  %v772_v18 = vadd.f32 %v767_v15, %v754_v50 }
 0x25c   : > { %v755_v5 = vadd.f32 %v750_v47, %v741_v3 }
 0x25d   : > { %v921_v7 = vpop.permute.xlu0 %920  ;;  %v769_v10 = vpop.permute.xlu1 %768 }
 0x25e   : > { %v926_v13 = vadd.f32 %v921_v7, %v908_v6  ;;  %v773_v45 = vadd.f32 %v769_v10, %v755_v5 }
 0x260   : > { %v928_v53 = vpack.c.bf16 %v927_v11, %v926_v13 }
 0x261   : > { %v785_v21 = vpop.permute.xlu0 %784  ;;  %v787_v43 = vpop.permute.xlu1 %786 }
 0x262   : > { %v1043_v16 = vrot.slane %v928_v53, 2  ;;  %v790_v24 = vadd.f32 %v785_v21, %v772_v18  ;;  %v791_v30 = vadd.f32 %v787_v43, %v773_v45  ;;  %v1535_v43 = vld [vmem:[%s2255_s3 + $0x8] sm:$0xff]  }
 0x264   : > { %v792_v31 = vpack.c.bf16 %v791_v30, %v790_v24  ;;  %1044 = vrot.lane.b32.xlu0 %v1043_v16, %s1603_s23  ;;  %v1536_v16 = vld [vmem:[%s2255_s3] sm:$0xff]  }
 0x265   : > { %v583_v36 = vpop.permute.xlu1 %582  ;;  %v456_v26 = vpop.permute.xlu0 %455 }
 0x266   : > { %1091 = vrot.lane.b32.xlu1 %v792_v31, %s1603_s23  ;;  %v460_v47 = vadd.f32 %v456_v26, %v445_v8  ;;  %v585_v28 = vadd.f32 %v583_v36, %v2009_v9  ;;  %v1537_v26 = vld [vmem:[%s2256_s4] sm:$0x1f]  }
 0x267   : > { %v1205_v8 = vsel %vm945_vm4, %v1537_v26, 0 }
 0x269   : > { %v471_v55 = vpop.permute.xlu1 %470  ;;  %v454_v17 = vpop.permute.xlu0 %453 }
 0x26a   : > { %v475_v41 = vadd.f32 %v471_v55, %v460_v47  ;;  %v459_v34 = vadd.f32 %v454_v17, %v2021_v19  ;;  %v1538_v47 = vld [vmem:[%s2256_s4 + $0x8] sm:$0x1f]  }
 0x26b   : > { %v1153_v55 = vsel %vm945_vm4, %v1538_v47, 0 }
 0x26c   : > { %v598_v46 = vadd.f32 %v2068_v59, %v475_v41  ;;  %v490_v1 = vadd.f32 %v2053_v60, %v475_v41 }
 0x26d   : > { %v469_v56 = vpop.permute.xlu1 %468  ;;  %v589_v37 = vpop.permute.xlu0 %588 }
 0x26e   : > { %v474_v4 = vadd.f32 %v469_v56, %v459_v34  ;;  %v591_v29 = vadd.f32 %v589_v37, %v585_v28 }
 0x270   : > { %v599_v33 = vadd.f32 %v594_v51, %v591_v29  ;;  %v489_v27 = vadd.f32 %v2072_v23, %v474_v4 }
 0x271   : > { %v607_v48 = vpop.permute.xlu1 %606  ;;  %v605_v25 = vpop.permute.xlu0 %604 }
 0x272   : > { %v611_v54 = vadd.f32 %v607_v48, %v599_v33  ;;  %v610_v62 = vadd.f32 %v605_v25, %v598_v46 }
 0x275   : > { %v504_v57 = vpop.permute.xlu1 %503  ;;  %v502_v35 = vpop.permute.xlu0 %501 }
 0x276   : > { %v507_v59 = vadd.f32 %v502_v35, %v489_v27  ;;  %v508_v49 = vadd.f32 %v504_v57, %v490_v1 }
 0x279   : > { %v619_v9 = vpop.permute.xlu1 %618  ;;  %v617_v14 = vpop.permute.xlu0 %616 }
 0x27a   : > { %v623_v19 = vadd.f32 %v619_v9, %v611_v54  ;;  %v622_v40 = vadd.f32 %v617_v14, %v610_v62 }
 0x27c   : > { %v631_v39 = vadd.f32 %v626_v52, %v623_v19  ;;  %v630_v58 = vadd.f32 %v2081_v22, %v622_v40 }
 0x27d   : > { %v522_v20 = vpop.permute.xlu1 %521  ;;  %v520_v51 = vpop.permute.xlu0 %519 }
 0x27e   : > { %v525_v42 = vadd.f32 %v520_v51, %v507_v59  ;;  %v526_v63 = vadd.f32 %v522_v20, %v508_v49 }
 0x280   : > { %v540_v23 = vadd.f32 %v2085_v32, %v525_v42  ;;  %v541_v52 = vadd.f32 %v2059_v2, %v526_v63 }
 0x281   : > { %v639_v0 = vpop.permute.xlu1 %638  ;;  %v637_v50 = vpop.permute.xlu0 %636 }
 0x282   : > { %v643_v3 = vadd.f32 %v639_v0, %v631_v39  ;;  %v642_v44 = vadd.f32 %v637_v50, %v630_v58 }
 0x285   : > { %v555_v61 = vpop.permute.xlu1 %554  ;;  %v553_v15 = vpop.permute.xlu0 %552 }
 0x286   : > { %v559_v7 = vadd.f32 %v555_v61, %v541_v52  ;;  %v558_v10 = vadd.f32 %v553_v15, %v540_v23 }
 0x289   : > { %v651_v6 = vpop.permute.xlu1 %650  ;;  %v649_v38 = vpop.permute.xlu0 %648 }
 0x28a   : > { %v655_v22 = vadd.f32 %v651_v6, %v643_v3  ;;  %v654_v5 = vadd.f32 %v649_v38, %v642_v44 }
 0x28c   : > { %v656_v11 = vpack.c.bf16 %v655_v22, %v654_v5 }
 0x28d   : > { %v573_v32 = vpop.permute.xlu1 %572  ;;  %v571_v13 = vpop.permute.xlu0 %570 }
 0x28e   : > { %v940_v18 = vrot.slane %v656_v11, 2  ;;  %v577_v60 = vadd.f32 %v573_v32, %v559_v7  ;;  %v576_v53 = vadd.f32 %v571_v13, %v558_v10 }
 0x290   : > { %v578_v45 = vpack.c.bf16 %v577_v60, %v576_v53  ;;  %v947_v21 = vsel %vm945_vm4, %v940_v18, 0 }
 0x291   : > { %1440 = vmatpush3.bf16.msra.mxu0 %v947_v21 }
 0x292   : > { %v999_v2 = vsel %vm945_vm4, %v578_v45, 0  ;;  %1451 = vmatprep.subr.bf16.mxu0 %v1601_v12 }
 0x293   : > { %1446 = vmatpush3.bf16.msra.mxu1 %v999_v2 }
 0x294   : > { %1442 = vmatmul.mubr.msk.bf16.vlgmr.msra.gmra.mxu0 %vm941_vm5, %v1535_v43  ;;  %1457 = vmatprep.subr.bf16.mxu1 %v1601_v12 }
 0x295   : > { %1453 = vmatprep.mubr.msk.bf16.mxu0 %vm1602_vm3, %v1601_v12 }
 0x296   : > { %1448 = vmatmul.mubr.msk.bf16.vlgmr.msra.gmra.mxu1 %vm941_vm5, %v1536_v16 }
 0x297   : > { %1459 = vmatprep.mubr.msk.bf16.mxu1 %vm1602_vm3, %v1601_v12 }
 0x2d6   : > { %v1045_v24 = vpop.permute.xlu0 %1044 }
 0x2d7   : > { %v1047_v30 = vsel %vm945_vm4, %v1045_v24, 0 }
 0x2d8   : > { %v1092_v31 = vpop.permute.xlu1 %1091  ;;  %1452 = vmatpush3.bf16.msra.mxu0 %v1047_v30 }
 0x2d9   : > { %v1094_v36 = vsel %vm945_vm4, %v1092_v31, 0  ;;  %1463 = vmatprep.subr.bf16.mxu0 %v1601_v12 }
 0x2da   : > { %1458 = vmatpush3.bf16.msra.mxu1 %v1094_v36 }
 0x2db   : > { %1454 = vmatmul.mubr.msk.bf16.vlgmr.msra.gmra.mxu0 %vm941_vm5, %v1535_v43  ;;  %1469 = vmatprep.subr.bf16.mxu1 %v1601_v12 }
 0x2dc   : > { %1465 = vmatprep.mubr.msk.bf16.mxu0 %vm1602_vm3, %v1601_v12  ;;  %1464 = vmatpush3.bf16.msra.mxu0 %v1153_v55 }
 0x2dd   : > { %1460 = vmatmul.mubr.msk.bf16.vlgmr.msra.gmra.mxu1 %vm941_vm5, %v1536_v16 }
 0x2de   : > { %1471 = vmatprep.mubr.msk.bf16.mxu1 %vm1602_vm3, %v1601_v12  ;;  %1470 = vmatpush3.bf16.msra.mxu1 %v1205_v8 }
 0x354   : > { %v983_v17 = vpop.f32.mrf.mxu0 }
 0x356   : > { %v1035_v41 = vpop.f32.mrf.mxu1  ;;  %v1443_v28 = vpop.f32.mrf.mxu0 }
 0x357   : > { %v1036_v56 = vadd.f32 %v1035_v41, %v983_v17 }
 0x358   : > { %v1449_v34 = vpop.f32.mrf.mxu1  ;;  %v986_v46 = vpop.f32.mrf.mxu0 }
 0x35a   : > { %v1038_v37 = vpop.f32.mrf.mxu1  ;;  %v1444_v4 = vpop.f32.mrf.mxu0 }
 0x35b   : > { %v1039_v29 = vadd.f32 %v1038_v37, %v986_v46 }
 0x35c   : > { %v1450_v12 = vpop.f32.mrf.mxu1 }
 0x35d   : > { %v1137_v33 = vpack.c.bf16 %v1039_v29, %v1036_v56 }
 0x35f   : > { %1472 = vmatmul.mubr.msk.bf16.vlgmr.msra.gmra.mxu1 %vm941_vm5, %v1137_v33 }
 0x39b   : > { %v1083_v27 = vpop.f32.mrf.mxu0 }
 0x39d   : > { %v1130_v48 = vpop.f32.mrf.mxu1  ;;  %v1455_v25 = vpop.f32.mrf.mxu0 }
 0x39e   : > { %v1131_v9 = vadd.f32 %v1130_v48, %v1083_v27 }
 0x39f   : > { %v1461_v57 = vpop.f32.mrf.mxu1  ;;  %v1086_v35 = vpop.f32.mrf.mxu0 }
 0x3a1   : > { %v1133_v54 = vpop.f32.mrf.mxu1  ;;  %v1456_v62 = vpop.f32.mrf.mxu0 }
 0x3a2   : > { %v1134_v14 = vadd.f32 %v1133_v54, %v1086_v35 }
 0x3a3   : > { %v1462_v19 = vpop.f32.mrf.mxu1 }
 0x3a4   : > { %v1140_v40 = vpack.c.bf16 %v1134_v14, %v1131_v9 }
 0x3a6   : > { %1466 = vmatmul.mubr.msk.bf16.vlgmr.msra.gmra.mxu0 %vm941_vm5, %v1140_v40 }
 0x41f   : > { %v1241_v59 = vpop.f32.mrf.mxu1 }
 0x421   : > { %v1473_v39 = vpop.f32.mrf.mxu1 }
 0x423   : > { %v1244_v58 = vpop.f32.mrf.mxu1 }
 0x425   : > { %v1474_v20 = vpop.f32.mrf.mxu1 }
 0x466   : > { %v1189_v51 = vpop.f32.mrf.mxu0 }
 0x467   : > { %v1242_v42 = vadd.f32 %v1241_v59, %v1189_v51 }
 0x468   : > { %v1467_v23 = vpop.f32.mrf.mxu0 }
 0x469   : > { %v1407_v0 = vpack.c.bf16 %v1242_v42, %v1242_v42 }
 0x46a   : > { %v1192_v50 = vpop.f32.mrf.mxu0 }
 0x46b   : > { %1257 = vst.msk [vmem:[%s301_s28] sm:$0xf] %vm1256_vm6, %v1407_v0  ;;  %v1245_v1 = vadd.f32 %v1244_v58, %v1192_v50 }
 0x46c   : > { %v1468_v49 = vpop.f32.mrf.mxu0 }
 0x46d   : > { %v1408_v61 = vpack.c.bf16 %v1245_v1, %v1245_v1 }
 0x46f   : > { %1258 = vst.msk [vmem:[%s301_s28 + $0x4] sm:$0xf] %vm1256_vm6, %v1408_v61 }
 0x470 PF: > { %s17_s25 = sadd.s32 1, %s1596_s25   ;;  %s2277_s21 = sld [smem:[#allocation5_spill]] }
 0x471   : > { %p14_p3 = scmp.ge.s32.totalorder %s17_s25, 10   ;;  %s2278_s22 = sld [smem:[#allocation6_spill]] }
 0x472   : > { %s2279_s23 = sld [smem:[#allocation7_spill]] }
 0x473   : > { %s2280_s24 = sld [smem:[#allocation8_spill]]  ;;  %16 = sbr.rel (!%p14_p3) target bundleno = 8 (0x8), region = 81 }
 0x478   :  { %1288 = vsyncpa [#allocation3], 1 }
 0x479   :  { %1290 = vsyncpa [#allocation3 + $0x1], 1 }

</bundles_post_ra>
